<compile_context>
chip_gen: v7x
topology: tpu7x:2x2x1
jax: 0.10.0
libtpu: 0.0.40
codegen_flags: <defaults>
</compile_context>

<pallas_src>
import functools

import numpy as np
import jax
import jax.numpy as jnp
from jax.experimental import pallas as pl
from jax.experimental.pallas import tpu as pltpu

# ---------------- model hyper-parameters (small, module-consistent) ----------
INPUT_DIM = 16
HIDDEN_DIM = 32
STATE_DIM = 8
CHEM_DIM = 8
PHYS_DIM = 4
SM_HIDDEN = 32
NUM_HEADS = 4
HEAD_DIM = HIDDEN_DIM // NUM_HEADS


# ---------------- host-side constant staging matrices -------------------------
def _attention_constants(B, T, nh, hd):
    """Row-expansion, head-column mask and block-diagonal score mask."""
    NR, N, H = B * nh * T, B * T, nh * hd
    r_exp = np.zeros((NR, N), np.float32)        # replicate x rows per head
    hmask = np.zeros((NR, H), np.float32)        # keep only own head's columns
    for b in range(B):
        for h in range(nh):
            for t in range(T):
                r = b * nh * T + h * T + t
                r_exp[r, b * T + t] = 1.0
                hmask[r, h * hd:(h + 1) * hd] = 1.0
    r_col = np.ascontiguousarray(r_exp.T)        # collapse staged rows back
    blk = np.arange(NR) // T                     # (b, h) block index
    bdmask = np.where(blk[:, None] == blk[None, :], 0.0, -1e30).astype(np.float32)
    return r_exp, r_col, hmask, bdmask


def _rnn_select(B, T):
    """Permutation (B*T, B*T): batch-major rows -> time-major rows."""
    N = B * T
    sel = np.zeros((N, N), np.float32)
    for t in range(T):
        for b in range(B):
            sel[t * B + b, b * T + t] = 1.0
    return sel


def _hist_avg(B, t_hist):
    """Averaging matrix so the history mean is a single matmul."""
    k = B * t_hist
    k_pad = int(np.ceil(k / 8.0) * 8)
    a = np.zeros((B, k_pad), np.float32)
    for b in range(B):
        a[b, b * t_hist:(b + 1) * t_hist] = 1.0 / t_hist
    return a, k_pad


# ---------------- the single fused kernel -------------------------------------
def _mai_gem_fused_kernel(
    # data
    x_ref,          # (B*T, D_in)   batch-major rows
    xd_ref,         # (B, T*D_in)   lane-dense copy for the MSE
    sphys_ref,      # (B, PHYS)
    tphys_ref,      # (B, PHYS)
    # projections (pre-fused on host where possible)
    in_w_ref, in_b_ref,                 # (D_in, H), (1, H)   residual path
    wxq_ref, bxq_ref,                   # (D_in, H), (1, H)   = in_w @ Wq
    wxk_ref, bxk_ref,
    wxv_ref, bxv_ref,
    wo_ref, bo_ref,                     # (H, H), (1, H)      MHA out proj
    t_wx_ref, t_bh_ref, t_wh_ref,       # (H, S), (1, S), (S, S)
    w_hy_ref, b_hy_ref,                 # (T*S, T*D_in), (1, T*D_in) = kron(I, t_wo@out_w)
    # constant staging matrices
    rexp_ref,       # (B*nh*T, B*T)
    rcol_ref,       # (B*T, B*nh*T)
    hmask_ref,      # (B*nh*T, H)
    bdmask_ref,     # (B*nh*T, B*nh*T)
    sel_ref,        # (B*T, B*T)
    # metabolic / self-model
    met_w0_ref, met_w1_ref, met_b_ref,  # (1, C), (1, C), (1, C)
    a_hist_ref,     # (B, K_pad)
    hist_ref,       # (K_pad, S+C)
    sm_w1_ref, sm_b1_ref, sm_w2_ref, sm_b2_ref,
    rnd_ref,        # (B, S)
    # outputs
    y_ref,          # (B, T*D_in)   VMEM, lane-dense
    wpe_ref,        # (1, 1)        SMEM  world-prediction MSE
    he_ref,         # (1, 1)        SMEM  homeostatic MSE
    sml_ref,        # (1, 1)        SMEM  self-model MSE
    *, B, T, D_in, head_dim, state_dim, chem_dim,
):
    f32 = jnp.float32
    x = x_ref[...]                                                   # (B*T, D_in)

    # ---- homeostatic loss (mean squared error) --------------------------------
    dph = sphys_ref[...] - tphys_ref[...]
    he = jnp.sum(dph * dph, keepdims=True) * (
        1.0 / float(sphys_ref.shape[0] * sphys_ref.shape[1]))        # (1, 1)
    he_ref[0, 0] = he[0, 0]

    # ---- input projection (kept only for the residual) ------------------------
    xp = jnp.dot(x, in_w_ref[...], preferred_element_type=f32) + in_b_ref[...]

    # ---- StructuralCore: block-diagonal masked MHA -----------------------------
    # Stage x rows per (batch, head) with a constant 0/1 matmul, project with the
    # pre-fused QKV weights, mask K/V to their own head columns, then do ONE
    # scores matmul (A.B^T form), one softmax and one P@V over all heads.
    x_rep = jnp.dot(rexp_ref[...], x, preferred_element_type=f32)    # (B*nh*T, D_in)
    q_rep = jnp.dot(x_rep, wxq_ref[...], preferred_element_type=f32) + bxq_ref[...]
    k_rep = jnp.dot(x_rep, wxk_ref[...], preferred_element_type=f32) + bxk_ref[...]
    v_rep = jnp.dot(x_rep, wxv_ref[...], preferred_element_type=f32) + bxv_ref[...]

    hm = hmask_ref[...]
    k_m = k_rep * hm
    v_m = v_rep * hm

    scale = 1.0 / float(head_dim) ** 0.5
    s = jax.lax.dot_general(q_rep, k_m, (((1,), (1,)), ((), ())),
                            preferred_element_type=f32)              # (NR, NR)
    s = s * scale + bdmask_ref[...]
    m = jnp.max(s, axis=-1, keepdims=True)
    e = jnp.exp(s - m)
    p = e / jnp.sum(e, axis=-1, keepdims=True)                        # exact softmax
    o_wide = jnp.dot(p, v_m, preferred_element_type=f32)             # (NR, H)
    attn = jnp.dot(rcol_ref[...], o_wide, preferred_element_type=f32)  # (B*T, H)
    mha = jnp.dot(attn, wo_ref[...], preferred_element_type=f32) + bo_ref[...]
    xs = xp + mha                                                     # residual

    # ---- TemporalCore (Elman RNN, batched over B, hoisted projections) --------
    xw = jnp.dot(xs, t_wx_ref[...], preferred_element_type=f32) + t_bh_ref[...]
    xw_tm = jnp.dot(sel_ref[...], xw, preferred_element_type=f32)    # time-major (T*B, S)
    wh = t_wh_ref[...]
    hs = []
    h = None
    for t in range(T):                                                # static unroll
        x_t = xw_tm[t * B:(t + 1) * B, :]                             # (B, S)
        if t == 0:
            h = jnp.tanh(x_t)                                         # h_{-1} = 0
        else:
            h = jnp.tanh(x_t + jnp.dot(h, wh, preferred_element_type=f32))
        hs.append(h)
    hs_dense = jnp.concatenate(hs, axis=1)                            # (B, T*S)

    # ---- fused RNN-out + output projection, lane-dense y -----------------------
    y = jnp.dot(hs_dense, w_hy_ref[...], preferred_element_type=f32) + b_hy_ref[...]
    y_ref[...] = y                                                    # (B, T*D_in)

    # ---- world-prediction MSE (fused reduction) --------------------------------
    dw = y - xd_ref[...]
    wpe = jnp.sum(dw * dw, keepdims=True) * (1.0 / float(B * T * D_in))
    wpe_ref[0, 0] = wpe[0, 0]

    # ---- MetabolicCore: S_chem = sigmoid([wpe, he] @ W + b) (VPU only) ---------
    chem = jax.nn.sigmoid(wpe * met_w0_ref[...] + he * met_w1_ref[...]
                          + met_b_ref[...])                           # (1, C)

    # ---- SelfModelCore: history mean -> MLP -> fused self-model MSE ------------
    feat = jnp.dot(a_hist_ref[...], hist_ref[...], preferred_element_type=f32)  # (B, S+C)
    h1 = jnp.maximum(
        jnp.dot(feat, sm_w1_ref[...], preferred_element_type=f32) + sm_b1_ref[...], 0.0)
    pred = jnp.dot(h1, sm_w2_ref[...], preferred_element_type=f32) + sm_b2_ref[...]
    d1 = pred[:, :state_dim] - rnd_ref[...]
    d2 = pred[:, state_dim:state_dim + chem_dim] - chem               # broadcast over B
    sss = jnp.sum(d1 * d1, keepdims=True) + jnp.sum(d2 * d2, keepdims=True)
    sml_ref[0, 0] = sss[0, 0] * (1.0 / float(B * (state_dim + chem_dim)))


# ---------------- parameter init (deterministic, synthetic) --------------------
def _init(key, shape):
    return jax.random.normal(key, shape, jnp.float32) / jnp.sqrt(float(shape[0]))


def init_params(key):
    ks = jax.random.split(key, 16)
    return {
        "in_w": _init(ks[0], (INPUT_DIM, HIDDEN_DIM)),
        "in_b": jnp.zeros((1, HIDDEN_DIM), jnp.float32),
        "out_w": _init(ks[1], (HIDDEN_DIM, INPUT_DIM)),
        "out_b": jnp.zeros((1, INPUT_DIM), jnp.float32),
        # StructuralCore (MHA)
        "w_q": _init(ks[2], (HIDDEN_DIM, HIDDEN_DIM)),
        "b_q": jnp.zeros((1, HIDDEN_DIM), jnp.float32),
        "w_k": _init(ks[3], (HIDDEN_DIM, HIDDEN_DIM)),
        "b_k": jnp.zeros((1, HIDDEN_DIM), jnp.float32),
        "w_v": _init(ks[4], (HIDDEN_DIM, HIDDEN_DIM)),
        "b_v": jnp.zeros((1, HIDDEN_DIM), jnp.float32),
        "wo_attn": _init(ks[5], (HIDDEN_DIM, HIDDEN_DIM)),
        "bo_attn": jnp.zeros((1, HIDDEN_DIM), jnp.float32),
        # TemporalCore (Elman RNN)
        "t_wx": _init(ks[6], (HIDDEN_DIM, STATE_DIM)),
        "t_wh": _init(ks[7], (STATE_DIM, STATE_DIM)),
        "t_bh": jnp.zeros((1, STATE_DIM), jnp.float32),
        "t_wo": _init(ks[8], (STATE_DIM, HIDDEN_DIM)),
        "t_bo": jnp.zeros((1, HIDDEN_DIM), jnp.float32),
        # MetabolicCore (2 scalars -> chem_dim)
        "met_w": _init(ks[9], (2, CHEM_DIM)),
        "met_b": jnp.zeros((1, CHEM_DIM), jnp.float32),
        # SelfModelCore
        "sm_w1": _init(ks[10], (STATE_DIM + CHEM_DIM, SM_HIDDEN)),
        "sm_b1": jnp.zeros((1, SM_HIDDEN), jnp.float32),
        "sm_w2": _init(ks[11], (SM_HIDDEN, STATE_DIM + CHEM_DIM)),
        "sm_b2": jnp.zeros((1, STATE_DIM + CHEM_DIM), jnp.float32),
    }


# ---------------- full forward pass (one pallas_call) ---------------------------
def mai_gem_forward(params, x_seq, s_phys, target_s_phys,
                    internal_state_history, rng_key):
    B, T, D_in = x_seq.shape
    T_HIST = internal_state_history.shape[1]
    D_SM = STATE_DIM + CHEM_DIM

    x_flat = x_seq.reshape(B * T, D_in)
    x_dense = x_seq.reshape(B, T * D_in)

    # ---- host-side weight pre-fusion (fp reassociation only) ------------------
    wxq = params["in_w"] @ params["w_q"]
    bxq = params["in_b"] @ params["w_q"] + params["b_q"]
    wxk = params["in_w"] @ params["w_k"]
    bxk = params["in_b"] @ params["w_k"] + params["b_k"]
    wxv = params["in_w"] @ params["w_v"]
    bxv = params["in_b"] @ params["w_v"] + params["b_v"]
    w_hy = params["t_wo"] @ params["out_w"]                  # (S, D_in)
    b_hy = params["t_bo"] @ params["out_w"] + params["out_b"]
    w_hy_big = jnp.kron(jnp.eye(T, dtype=jnp.float32), w_hy)  # (T*S, T*D_in)
    b_hy_big = jnp.tile(b_hy, (1, T))                          # (1, T*D_in)

    # ---- constant staging matrices (baked as jit constants) -------------------
    r_exp, r_col, hmask, bdmask = _attention_constants(B, T, NUM_HEADS, HEAD_DIM)
    sel = _rnn_select(B, T)
    a_hist, k_pad = _hist_avg(B, T_HIST)

    hist_flat = internal_state_history.reshape(B * T_HIST, D_SM)
    hist_pad = jnp.pad(hist_flat, ((0, k_pad - B * T_HIST), (0, 0)))

    met_w0 = params["met_w"][0:1, :]
    met_w1 = params["met_w"][1:2, :]

    rnd = jax.random.normal(rng_key, (B, STATE_DIM), jnp.float32)

    kernel = functools.partial(
        _mai_gem_fused_kernel, B=B, T=T, D_in=D_in,
        head_dim=HEAD_DIM, state_dim=STATE_DIM, chem_dim=CHEM_DIM)

    y_dense, wpe, he, sml = pl.pallas_call(
        kernel,
        out_shape=(
            jax.ShapeDtypeStruct((B, T * D_in), jnp.float32),
            jax.ShapeDtypeStruct((1, 1), jnp.float32),
            jax.ShapeDtypeStruct((1, 1), jnp.float32),
            jax.ShapeDtypeStruct((1, 1), jnp.float32),
        ),
        out_specs=(
            pl.BlockSpec(memory_space=pltpu.MemorySpace.VMEM),
            pl.BlockSpec(memory_space=pltpu.MemorySpace.SMEM),
            pl.BlockSpec(memory_space=pltpu.MemorySpace.SMEM),
            pl.BlockSpec(memory_space=pltpu.MemorySpace.SMEM),
        ),
    )(x_flat, x_dense, s_phys, target_s_phys,
      params["in_w"], params["in_b"],
      wxq, bxq, wxk, bxk, wxv, bxv,
      params["wo_attn"], params["bo_attn"],
      params["t_wx"], params["t_bh"], params["t_wh"],
      w_hy_big, b_hy_big,
      r_exp, r_col, hmask, bdmask, sel,
      met_w0, met_w1, params["met_b"],
      a_hist, hist_pad,
      params["sm_w1"], params["sm_b1"], params["sm_w2"], params["sm_b2"],
      rnd)

    y_pred = y_dense.reshape(B, T, D_in)
    losses = {
        "world_prediction": wpe[0, 0],
        "homeostatic": he[0, 0],
        "self_model": sml[0, 0],
    }
    return y_pred, losses


# ---------------- demo -----------------------------------------------------------
if __name__ == "__main__":
    B, T, T_HIST = 2, 8, 6

    key = jax.random.PRNGKey(0)
    k_x, k_phys, k_tphys, k_hist, k_rand = jax.random.split(key, 5)

    x_seq = jax.random.normal(k_x, (B, T, INPUT_DIM), jnp.float32)
    s_phys = jax.random.normal(k_phys, (B, PHYS_DIM), jnp.float32)
    target_s_phys = jax.random.normal(k_tphys, (B, PHYS_DIM), jnp.float32)
    internal_state_history = jax.random.normal(
        k_hist, (B, T_HIST, STATE_DIM + CHEM_DIM), jnp.float32)

    params = init_params(jax.random.PRNGKey(42))

    fwd = jax.jit(mai_gem_forward)
    y_pred, losses = fwd(params, x_seq, s_phys, target_s_phys,
                         internal_state_history, k_rand)
    jax.block_until_ready((y_pred, losses))

    assert y_pred.shape == (B, T, INPUT_DIM)
    assert all(jnp.ndim(v) == 0 for v in losses.values())
    assert all(bool(jnp.isfinite(v)) for v in losses.values())
    print("KERNEL_OK")
</pallas_src>

<mosaic_0001>
module attributes {stable_mosaic.version = 11 : i64} {
  func.func @_mai_gem_fused_kernel(%arg0: memref<16x16xf32, #tpu.memory_space<vmem>>, %arg1: memref<2x128xf32, #tpu.memory_space<vmem>>, %arg2: memref<2x4xf32, #tpu.memory_space<vmem>>, %arg3: memref<2x4xf32, #tpu.memory_space<vmem>>, %arg4: memref<16x32xf32, #tpu.memory_space<vmem>>, %arg5: memref<1x32xf32, #tpu.memory_space<vmem>>, %arg6: memref<16x32xf32, #tpu.memory_space<vmem>>, %arg7: memref<1x32xf32, #tpu.memory_space<vmem>>, %arg8: memref<16x32xf32, #tpu.memory_space<vmem>>, %arg9: memref<1x32xf32, #tpu.memory_space<vmem>>, %arg10: memref<16x32xf32, #tpu.memory_space<vmem>>, %arg11: memref<1x32xf32, #tpu.memory_space<vmem>>, %arg12: memref<32x32xf32, #tpu.memory_space<vmem>>, %arg13: memref<1x32xf32, #tpu.memory_space<vmem>>, %arg14: memref<32x8xf32, #tpu.memory_space<vmem>>, %arg15: memref<1x8xf32, #tpu.memory_space<vmem>>, %arg16: memref<8x8xf32, #tpu.memory_space<vmem>>, %arg17: memref<64x128xf32, #tpu.memory_space<vmem>>, %arg18: memref<1x128xf32, #tpu.memory_space<vmem>>, %arg19: memref<64x16xf32, #tpu.memory_space<vmem>>, %arg20: memref<16x64xf32, #tpu.memory_space<vmem>>, %arg21: memref<64x32xf32, #tpu.memory_space<vmem>>, %arg22: memref<64x64xf32, #tpu.memory_space<vmem>>, %arg23: memref<16x16xf32, #tpu.memory_space<vmem>>, %arg24: memref<1x8xf32, #tpu.memory_space<vmem>>, %arg25: memref<1x8xf32, #tpu.memory_space<vmem>>, %arg26: memref<1x8xf32, #tpu.memory_space<vmem>>, %arg27: memref<2x16xf32, #tpu.memory_space<vmem>>, %arg28: memref<16x16xf32, #tpu.memory_space<vmem>>, %arg29: memref<16x32xf32, #tpu.memory_space<vmem>>, %arg30: memref<1x32xf32, #tpu.memory_space<vmem>>, %arg31: memref<32x16xf32, #tpu.memory_space<vmem>>, %arg32: memref<1x16xf32, #tpu.memory_space<vmem>>, %arg33: memref<2x8xf32, #tpu.memory_space<vmem>>, %arg34: memref<2x128xf32, #tpu.memory_space<vmem>>, %arg35: memref<1x1xf32, #tpu.memory_space<smem>>, %arg36: memref<1x1xf32, #tpu.memory_space<smem>>, %arg37: memref<1x1xf32, #tpu.memory_space<smem>>) attributes {dimension_semantics = [], scalar_prefetch = 0 : i64, scratch_operands = 0 : i64, tpu.core_type = #tpu.core_type<tc>} {
    %c0 = arith.constant 0 : index
    %c0_0 = arith.constant 0 : index
    %0 = vector.load %arg0[%c0, %c0_0] : memref<16x16xf32, #tpu.memory_space<vmem>>, vector<16x16xf32>
    %c0_1 = arith.constant 0 : index
    %c0_2 = arith.constant 0 : index
    %1 = vector.load %arg2[%c0_1, %c0_2] : memref<2x4xf32, #tpu.memory_space<vmem>>, vector<2x4xf32>
    %c0_3 = arith.constant 0 : index
    %c0_4 = arith.constant 0 : index
    %2 = vector.load %arg3[%c0_3, %c0_4] : memref<2x4xf32, #tpu.memory_space<vmem>>, vector<2x4xf32>
    %3 = arith.subf %1, %2 : vector<2x4xf32>
    %4 = arith.mulf %3, %3 : vector<2x4xf32>
    %5 = vector.shape_cast %4 : vector<2x4xf32> to vector<1x2x4xf32>
    %cst = arith.constant dense<0.000000e+00> : vector<1xf32>
    %6 = vector.multi_reduction <add>, %5, %cst [1, 2] : vector<1x2x4xf32> to vector<1xf32>
    %7 = vector.shape_cast %6 : vector<1xf32> to vector<1x1x1xf32>
    %8 = vector.extract %7[0, 0, 0] : f32 from vector<1x1x1xf32>
    %9 = vector.broadcast %8 : f32 to vector<1x1xf32>
    %cst_5 = arith.constant 1.250000e-01 : f32
    %10 = vector.broadcast %cst_5 : f32 to vector<1x1xf32>
    %11 = arith.mulf %9, %10 : vector<1x1xf32>
    %12 = vector.extract %11[0, 0] : f32 from vector<1x1xf32>
    %c0_6 = arith.constant 0 : index
    %c0_7 = arith.constant 0 : index
    %13 = memref.load %arg36[%c0_6, %c0_7] : memref<1x1xf32, #tpu.memory_space<smem>>
    memref.store %12, %arg36[%c0_6, %c0_7] : memref<1x1xf32, #tpu.memory_space<smem>>
    %c0_8 = arith.constant 0 : index
    %c0_9 = arith.constant 0 : index
    %14 = vector.load %arg4[%c0_8, %c0_9] : memref<16x32xf32, #tpu.memory_space<vmem>>, vector<16x32xf32>
    %cst_10 = arith.constant dense<0.000000e+00> : vector<16x32xf32>
    %15 = tpu.matmul %0, %14, %cst_10 {dimension_numbers = #tpu.dot_dimension_numbers<[1], [0], [0], [1], [0, 0, 1, 1], [], []>} : vector<16x16xf32>, vector<16x32xf32>, vector<16x32xf32> -> vector<16x32xf32>
    %c0_11 = arith.constant 0 : index
    %c0_12 = arith.constant 0 : index
    %16 = vector.load %arg5[%c0_11, %c0_12] : memref<1x32xf32, #tpu.memory_space<vmem>>, vector<1x32xf32>
    %17 = vector.broadcast %16 : vector<1x32xf32> to vector<16x32xf32>
    %18 = arith.addf %15, %17 : vector<16x32xf32>
    %c0_13 = arith.constant 0 : index
    %c0_14 = arith.constant 0 : index
    %19 = vector.load %arg19[%c0_13, %c0_14] : memref<64x16xf32, #tpu.memory_space<vmem>>, vector<64x16xf32>
    %cst_15 = arith.constant dense<0.000000e+00> : vector<64x16xf32>
    %20 = tpu.matmul %19, %0, %cst_15 {dimension_numbers = #tpu.dot_dimension_numbers<[1], [0], [0], [1], [0, 0, 1, 1], [], []>} : vector<64x16xf32>, vector<16x16xf32>, vector<64x16xf32> -> vector<64x16xf32>
    %c0_16 = arith.constant 0 : index
    %c0_17 = arith.constant 0 : index
    %21 = vector.load %arg6[%c0_16, %c0_17] : memref<16x32xf32, #tpu.memory_space<vmem>>, vector<16x32xf32>
    %cst_18 = arith.constant dense<0.000000e+00> : vector<64x32xf32>
    %22 = tpu.matmul %20, %21, %cst_18 {dimension_numbers = #tpu.dot_dimension_numbers<[1], [0], [0], [1], [0, 0, 1, 1], [], []>} : vector<64x16xf32>, vector<16x32xf32>, vector<64x32xf32> -> vector<64x32xf32>
    %c0_19 = arith.constant 0 : index
    %c0_20 = arith.constant 0 : index
    %23 = vector.load %arg7[%c0_19, %c0_20] : memref<1x32xf32, #tpu.memory_space<vmem>>, vector<1x32xf32>
    %24 = vector.broadcast %23 : vector<1x32xf32> to vector<64x32xf32>
    %25 = arith.addf %22, %24 : vector<64x32xf32>
    %c0_21 = arith.constant 0 : index
    %c0_22 = arith.constant 0 : index
    %26 = vector.load %arg8[%c0_21, %c0_22] : memref<16x32xf32, #tpu.memory_space<vmem>>, vector<16x32xf32>
    %cst_23 = arith.constant dense<0.000000e+00> : vector<64x32xf32>
    %27 = tpu.matmul %20, %26, %cst_23 {dimension_numbers = #tpu.dot_dimension_numbers<[1], [0], [0], [1], [0, 0, 1, 1], [], []>} : vector<64x16xf32>, vector<16x32xf32>, vector<64x32xf32> -> vector<64x32xf32>
    %c0_24 = arith.constant 0 : index
    %c0_25 = arith.constant 0 : index
    %28 = vector.load %arg9[%c0_24, %c0_25] : memref<1x32xf32, #tpu.memory_space<vmem>>, vector<1x32xf32>
    %29 = vector.broadcast %28 : vector<1x32xf32> to vector<64x32xf32>
    %30 = arith.addf %27, %29 : vector<64x32xf32>
    %c0_26 = arith.constant 0 : index
    %c0_27 = arith.constant 0 : index
    %31 = vector.load %arg10[%c0_26, %c0_27] : memref<16x32xf32, #tpu.memory_space<vmem>>, vector<16x32xf32>
    %cst_28 = arith.constant dense<0.000000e+00> : vector<64x32xf32>
    %32 = tpu.matmul %20, %31, %cst_28 {dimension_numbers = #tpu.dot_dimension_numbers<[1], [0], [0], [1], [0, 0, 1, 1], [], []>} : vector<64x16xf32>, vector<16x32xf32>, vector<64x32xf32> -> vector<64x32xf32>
    %c0_29 = arith.constant 0 : index
    %c0_30 = arith.constant 0 : index
    %33 = vector.load %arg11[%c0_29, %c0_30] : memref<1x32xf32, #tpu.memory_space<vmem>>, vector<1x32xf32>
    %34 = vector.broadcast %33 : vector<1x32xf32> to vector<64x32xf32>
    %35 = arith.addf %32, %34 : vector<64x32xf32>
    %c0_31 = arith.constant 0 : index
    %c0_32 = arith.constant 0 : index
    %36 = vector.load %arg21[%c0_31, %c0_32] : memref<64x32xf32, #tpu.memory_space<vmem>>, vector<64x32xf32>
    %37 = arith.mulf %30, %36 : vector<64x32xf32>
    %38 = arith.mulf %35, %36 : vector<64x32xf32>
    %cst_33 = arith.constant dense<0.000000e+00> : vector<64x64xf32>
    %39 = tpu.matmul %25, %37, %cst_33 {dimension_numbers = #tpu.dot_dimension_numbers<[1], [1], [0], [0], [0, 0, 1, 0], [], []>} : vector<64x32xf32>, vector<64x32xf32>, vector<64x64xf32> -> vector<64x64xf32>
    %cst_34 = arith.constant 0.353553385 : f32
    %40 = vector.broadcast %cst_34 : f32 to vector<64x64xf32>
    %41 = arith.mulf %39, %40 : vector<64x64xf32>
    %c0_35 = arith.constant 0 : index
    %c0_36 = arith.constant 0 : index
    %42 = vector.load %arg22[%c0_35, %c0_36] : memref<64x64xf32, #tpu.memory_space<vmem>>, vector<64x64xf32>
    %43 = arith.addf %41, %42 : vector<64x64xf32>
    %cst_37 = arith.constant dense<0xFF800000> : vector<64xf32>
    %44 = vector.multi_reduction <maximumf>, %43, %cst_37 [1] : vector<64x64xf32> to vector<64xf32>
    %45 = vector.shape_cast %44 : vector<64xf32> to vector<64x1xf32>
    %46 = vector.broadcast %45 : vector<64x1xf32> to vector<64x64xf32>
    %47 = arith.subf %43, %46 : vector<64x64xf32>
    %48 = math.exp %47 : vector<64x64xf32>
    %cst_38 = arith.constant dense<0.000000e+00> : vector<64xf32>
    %49 = vector.multi_reduction <add>, %48, %cst_38 [1] : vector<64x64xf32> to vector<64xf32>
    %50 = vector.shape_cast %49 : vector<64xf32> to vector<64x1xf32>
    %51 = vector.broadcast %50 : vector<64x1xf32> to vector<64x64xf32>
    %52 = arith.divf %48, %51 : vector<64x64xf32>
    %cst_39 = arith.constant dense<0.000000e+00> : vector<64x32xf32>
    %53 = tpu.matmul %52, %38, %cst_39 {dimension_numbers = #tpu.dot_dimension_numbers<[1], [0], [0], [1], [0, 0, 1, 1], [], []>} : vector<64x64xf32>, vector<64x32xf32>, vector<64x32xf32> -> vector<64x32xf32>
    %c0_40 = arith.constant 0 : index
    %c0_41 = arith.constant 0 : index
    %54 = vector.load %arg20[%c0_40, %c0_41] : memref<16x64xf32, #tpu.memory_space<vmem>>, vector<16x64xf32>
    %cst_42 = arith.constant dense<0.000000e+00> : vector<16x32xf32>
    %55 = tpu.matmul %54, %53, %cst_42 {dimension_numbers = #tpu.dot_dimension_numbers<[1], [0], [0], [1], [0, 0, 1, 1], [], []>} : vector<16x64xf32>, vector<64x32xf32>, vector<16x32xf32> -> vector<16x32xf32>
    %c0_43 = arith.constant 0 : index
    %c0_44 = arith.constant 0 : index
    %56 = vector.load %arg12[%c0_43, %c0_44] : memref<32x32xf32, #tpu.memory_space<vmem>>, vector<32x32xf32>
    %cst_45 = arith.constant dense<0.000000e+00> : vector<16x32xf32>
    %57 = tpu.matmul %55, %56, %cst_45 {dimension_numbers = #tpu.dot_dimension_numbers<[1], [0], [0], [1], [0, 0, 1, 1], [], []>} : vector<16x32xf32>, vector<32x32xf32>, vector<16x32xf32> -> vector<16x32xf32>
    %c0_46 = arith.constant 0 : index
    %c0_47 = arith.constant 0 : index
    %58 = vector.load %arg13[%c0_46, %c0_47] : memref<1x32xf32, #tpu.memory_space<vmem>>, vector<1x32xf32>
    %59 = vector.broadcast %58 : vector<1x32xf32> to vector<16x32xf32>
    %60 = arith.addf %57, %59 : vector<16x32xf32>
    %61 = arith.addf %18, %60 : vector<16x32xf32>
    %c0_48 = arith.constant 0 : index
    %c0_49 = arith.constant 0 : index
    %62 = vector.load %arg14[%c0_48, %c0_49] : memref<32x8xf32, #tpu.memory_space<vmem>>, vector<32x8xf32>
    %cst_50 = arith.constant dense<0.000000e+00> : vector<16x8xf32>
    %63 = tpu.matmul %61, %62, %cst_50 {dimension_numbers = #tpu.dot_dimension_numbers<[1], [0], [0], [1], [0, 0, 1, 1], [], []>} : vector<16x32xf32>, vector<32x8xf32>, vector<16x8xf32> -> vector<16x8xf32>
    %c0_51 = arith.constant 0 : index
    %c0_52 = arith.constant 0 : index
    %64 = vector.load %arg15[%c0_51, %c0_52] : memref<1x8xf32, #tpu.memory_space<vmem>>, vector<1x8xf32>
    %65 = vector.broadcast %64 : vector<1x8xf32> to vector<16x8xf32>
    %66 = arith.addf %63, %65 : vector<16x8xf32>
    %c0_53 = arith.constant 0 : index
    %c0_54 = arith.constant 0 : index
    %67 = vector.load %arg23[%c0_53, %c0_54] : memref<16x16xf32, #tpu.memory_space<vmem>>, vector<16x16xf32>
    %cst_55 = arith.constant dense<0.000000e+00> : vector<16x8xf32>
    %68 = tpu.matmul %67, %66, %cst_55 {dimension_numbers = #tpu.dot_dimension_numbers<[1], [0], [0], [1], [0, 0, 1, 1], [], []>} : vector<16x16xf32>, vector<16x8xf32>, vector<16x8xf32> -> vector<16x8xf32>
    %c0_56 = arith.constant 0 : index
    %c0_57 = arith.constant 0 : index
    %69 = vector.load %arg16[%c0_56, %c0_57] : memref<8x8xf32, #tpu.memory_space<vmem>>, vector<8x8xf32>
    %70 = vector.extract_strided_slice %68 {offsets = [0, 0], sizes = [2, 8], strides = [1, 1]} : vector<16x8xf32> to vector<2x8xf32>
    %71 = math.tanh %70 : vector<2x8xf32>
    %72 = vector.extract_strided_slice %68 {offsets = [2, 0], sizes = [2, 8], strides = [1, 1]} : vector<16x8xf32> to vector<2x8xf32>
    %cst_58 = arith.constant dense<0.000000e+00> : vector<2x8xf32>
    %73 = tpu.matmul %71, %69, %cst_58 {dimension_numbers = #tpu.dot_dimension_numbers<[1], [0], [0], [1], [0, 0, 1, 1], [], []>} : vector<2x8xf32>, vector<8x8xf32>, vector<2x8xf32> -> vector<2x8xf32>
    %74 = arith.addf %72, %73 : vector<2x8xf32>
    %75 = math.tanh %74 : vector<2x8xf32>
    %76 = vector.extract_strided_slice %68 {offsets = [4, 0], sizes = [2, 8], strides = [1, 1]} : vector<16x8xf32> to vector<2x8xf32>
    %cst_59 = arith.constant dense<0.000000e+00> : vector<2x8xf32>
    %77 = tpu.matmul %75, %69, %cst_59 {dimension_numbers = #tpu.dot_dimension_numbers<[1], [0], [0], [1], [0, 0, 1, 1], [], []>} : vector<2x8xf32>, vector<8x8xf32>, vector<2x8xf32> -> vector<2x8xf32>
    %78 = arith.addf %76, %77 : vector<2x8xf32>
    %79 = math.tanh %78 : vector<2x8xf32>
    %80 = vector.extract_strided_slice %68 {offsets = [6, 0], sizes = [2, 8], strides = [1, 1]} : vector<16x8xf32> to vector<2x8xf32>
    %cst_60 = arith.constant dense<0.000000e+00> : vector<2x8xf32>
    %81 = tpu.matmul %79, %69, %cst_60 {dimension_numbers = #tpu.dot_dimension_numbers<[1], [0], [0], [1], [0, 0, 1, 1], [], []>} : vector<2x8xf32>, vector<8x8xf32>, vector<2x8xf32> -> vector<2x8xf32>
    %82 = arith.addf %80, %81 : vector<2x8xf32>
    %83 = math.tanh %82 : vector<2x8xf32>
    %84 = vector.extract_strided_slice %68 {offsets = [8, 0], sizes = [2, 8], strides = [1, 1]} : vector<16x8xf32> to vector<2x8xf32>
    %cst_61 = arith.constant dense<0.000000e+00> : vector<2x8xf32>
    %85 = tpu.matmul %83, %69, %cst_61 {dimension_numbers = #tpu.dot_dimension_numbers<[1], [0], [0], [1], [0, 0, 1, 1], [], []>} : vector<2x8xf32>, vector<8x8xf32>, vector<2x8xf32> -> vector<2x8xf32>
    %86 = arith.addf %84, %85 : vector<2x8xf32>
    %87 = math.tanh %86 : vector<2x8xf32>
    %88 = vector.extract_strided_slice %68 {offsets = [10, 0], sizes = [2, 8], strides = [1, 1]} : vector<16x8xf32> to vector<2x8xf32>
    %cst_62 = arith.constant dense<0.000000e+00> : vector<2x8xf32>
    %89 = tpu.matmul %87, %69, %cst_62 {dimension_numbers = #tpu.dot_dimension_numbers<[1], [0], [0], [1], [0, 0, 1, 1], [], []>} : vector<2x8xf32>, vector<8x8xf32>, vector<2x8xf32> -> vector<2x8xf32>
    %90 = arith.addf %88, %89 : vector<2x8xf32>
    %91 = math.tanh %90 : vector<2x8xf32>
    %92 = vector.extract_strided_slice %68 {offsets = [12, 0], sizes = [2, 8], strides = [1, 1]} : vector<16x8xf32> to vector<2x8xf32>
    %cst_63 = arith.constant dense<0.000000e+00> : vector<2x8xf32>
    %93 = tpu.matmul %91, %69, %cst_63 {dimension_numbers = #tpu.dot_dimension_numbers<[1], [0], [0], [1], [0, 0, 1, 1], [], []>} : vector<2x8xf32>, vector<8x8xf32>, vector<2x8xf32> -> vector<2x8xf32>
    %94 = arith.addf %92, %93 : vector<2x8xf32>
    %95 = math.tanh %94 : vector<2x8xf32>
    %96 = vector.extract_strided_slice %68 {offsets = [14, 0], sizes = [2, 8], strides = [1, 1]} : vector<16x8xf32> to vector<2x8xf32>
    %cst_64 = arith.constant dense<0.000000e+00> : vector<2x8xf32>
    %97 = tpu.matmul %95, %69, %cst_64 {dimension_numbers = #tpu.dot_dimension_numbers<[1], [0], [0], [1], [0, 0, 1, 1], [], []>} : vector<2x8xf32>, vector<8x8xf32>, vector<2x8xf32> -> vector<2x8xf32>
    %98 = arith.addf %96, %97 : vector<2x8xf32>
    %99 = math.tanh %98 : vector<2x8xf32>
    %100 = tpu.concatenate %71, %75, %79, %83, %87, %91, %95, %99 in 1 : vector<2x8xf32>, vector<2x8xf32>, vector<2x8xf32>, vector<2x8xf32>, vector<2x8xf32>, vector<2x8xf32>, vector<2x8xf32>, vector<2x8xf32> -> vector<2x64xf32>
    %c0_65 = arith.constant 0 : index
    %c0_66 = arith.constant 0 : index
    %101 = vector.load %arg17[%c0_65, %c0_66] : memref<64x128xf32, #tpu.memory_space<vmem>>, vector<64x128xf32>
    %cst_67 = arith.constant dense<0.000000e+00> : vector<2x128xf32>
    %102 = tpu.matmul %100, %101, %cst_67 {dimension_numbers = #tpu.dot_dimension_numbers<[1], [0], [0], [1], [0, 0, 1, 1], [], []>} : vector<2x64xf32>, vector<64x128xf32>, vector<2x128xf32> -> vector<2x128xf32>
    %c0_68 = arith.constant 0 : index
    %c0_69 = arith.constant 0 : index
    %103 = vector.load %arg18[%c0_68, %c0_69] : memref<1x128xf32, #tpu.memory_space<vmem>>, vector<1x128xf32>
    %104 = vector.broadcast %103 : vector<1x128xf32> to vector<2x128xf32>
    %105 = arith.addf %102, %104 : vector<2x128xf32>
    %c0_70 = arith.constant 0 : index
    %c0_71 = arith.constant 0 : index
    %106 = vector.load %arg34[%c0_70, %c0_71] : memref<2x128xf32, #tpu.memory_space<vmem>>, vector<2x128xf32>
    tpu.vector_store %arg34[%c0_70, %c0_71], %105 {strides = array<i32>} : memref<2x128xf32, #tpu.memory_space<vmem>>, vector<2x128xf32>,
    %c0_72 = arith.constant 0 : index
    %c0_73 = arith.constant 0 : index
    %107 = vector.load %arg1[%c0_72, %c0_73] : memref<2x128xf32, #tpu.memory_space<vmem>>, vector<2x128xf32>
    %108 = arith.subf %105, %107 : vector<2x128xf32>
    %109 = arith.mulf %108, %108 : vector<2x128xf32>
    %110 = vector.shape_cast %109 : vector<2x128xf32> to vector<1x2x128xf32>
    %cst_74 = arith.constant dense<0.000000e+00> : vector<1xf32>
    %111 = vector.multi_reduction <add>, %110, %cst_74 [1, 2] : vector<1x2x128xf32> to vector<1xf32>
    %112 = vector.shape_cast %111 : vector<1xf32> to vector<1x1x1xf32>
    %113 = vector.extract %112[0, 0, 0] : f32 from vector<1x1x1xf32>
    %114 = vector.broadcast %113 : f32 to vector<1x1xf32>
    %cst_75 = arith.constant 3.906250e-03 : f32
    %115 = vector.broadcast %cst_75 : f32 to vector<1x1xf32>
    %116 = arith.mulf %114, %115 : vector<1x1xf32>
    %117 = vector.extract %116[0, 0] : f32 from vector<1x1xf32>
    %c0_76 = arith.constant 0 : index
    %c0_77 = arith.constant 0 : index
    %118 = memref.load %arg35[%c0_76, %c0_77] : memref<1x1xf32, #tpu.memory_space<smem>>
    memref.store %117, %arg35[%c0_76, %c0_77] : memref<1x1xf32, #tpu.memory_space<smem>>
    %c0_78 = arith.constant 0 : index
    %c0_79 = arith.constant 0 : index
    %119 = vector.load %arg24[%c0_78, %c0_79] : memref<1x8xf32, #tpu.memory_space<vmem>>, vector<1x8xf32>
    %120 = vector.broadcast %116 : vector<1x1xf32> to vector<1x8xf32>
    %121 = arith.mulf %120, %119 : vector<1x8xf32>
    %c0_80 = arith.constant 0 : index
    %c0_81 = arith.constant 0 : index
    %122 = vector.load %arg25[%c0_80, %c0_81] : memref<1x8xf32, #tpu.memory_space<vmem>>, vector<1x8xf32>
    %123 = vector.broadcast %11 : vector<1x1xf32> to vector<1x8xf32>
    %124 = arith.mulf %123, %122 : vector<1x8xf32>
    %125 = arith.addf %121, %124 : vector<1x8xf32>
    %c0_82 = arith.constant 0 : index
    %c0_83 = arith.constant 0 : index
    %126 = vector.load %arg26[%c0_82, %c0_83] : memref<1x8xf32, #tpu.memory_space<vmem>>, vector<1x8xf32>
    %127 = arith.addf %125, %126 : vector<1x8xf32>
    %128 = arith.negf %127 : vector<1x8xf32>
    %129 = math.exp %128 : vector<1x8xf32>
    %cst_84 = arith.constant 1.000000e+00 : f32
    %130 = vector.broadcast %cst_84 : f32 to vector<1x8xf32>
    %131 = arith.addf %130, %129 : vector<1x8xf32>
    %132 = arith.divf %130, %131 : vector<1x8xf32>
    %c0_85 = arith.constant 0 : index
    %c0_86 = arith.constant 0 : index
    %133 = vector.load %arg27[%c0_85, %c0_86] : memref<2x16xf32, #tpu.memory_space<vmem>>, vector<2x16xf32>
    %c0_87 = arith.constant 0 : index
    %c0_88 = arith.constant 0 : index
    %134 = vector.load %arg28[%c0_87, %c0_88] : memref<16x16xf32, #tpu.memory_space<vmem>>, vector<16x16xf32>
    %cst_89 = arith.constant dense<0.000000e+00> : vector<2x16xf32>
    %135 = tpu.matmul %133, %134, %cst_89 {dimension_numbers = #tpu.dot_dimension_numbers<[1], [0], [0], [1], [0, 0, 1, 1], [], []>} : vector<2x16xf32>, vector<16x16xf32>, vector<2x16xf32> -> vector<2x16xf32>
    %c0_90 = arith.constant 0 : index
    %c0_91 = arith.constant 0 : index
    %136 = vector.load %arg29[%c0_90, %c0_91] : memref<16x32xf32, #tpu.memory_space<vmem>>, vector<16x32xf32>
    %cst_92 = arith.constant dense<0.000000e+00> : vector<2x32xf32>
    %137 = tpu.matmul %135, %136, %cst_92 {dimension_numbers = #tpu.dot_dimension_numbers<[1], [0], [0], [1], [0, 0, 1, 1], [], []>} : vector<2x16xf32>, vector<16x32xf32>, vector<2x32xf32> -> vector<2x32xf32>
    %c0_93 = arith.constant 0 : index
    %c0_94 = arith.constant 0 : index
    %138 = vector.load %arg30[%c0_93, %c0_94] : memref<1x32xf32, #tpu.memory_space<vmem>>, vector<1x32xf32>
    %139 = vector.broadcast %138 : vector<1x32xf32> to vector<2x32xf32>
    %140 = arith.addf %137, %139 : vector<2x32xf32>
    %cst_95 = arith.constant 0.000000e+00 : f32
    %141 = vector.broadcast %cst_95 : f32 to vector<2x32xf32>
    %142 = arith.maximumf %140, %141 : vector<2x32xf32>
    %c0_96 = arith.constant 0 : index
    %c0_97 = arith.constant 0 : index
    %143 = vector.load %arg31[%c0_96, %c0_97] : memref<32x16xf32, #tpu.memory_space<vmem>>, vector<32x16xf32>
    %cst_98 = arith.constant dense<0.000000e+00> : vector<2x16xf32>
    %144 = tpu.matmul %142, %143, %cst_98 {dimension_numbers = #tpu.dot_dimension_numbers<[1], [0], [0], [1], [0, 0, 1, 1], [], []>} : vector<2x32xf32>, vector<32x16xf32>, vector<2x16xf32> -> vector<2x16xf32>
    %c0_99 = arith.constant 0 : index
    %c0_100 = arith.constant 0 : index
    %145 = vector.load %arg32[%c0_99, %c0_100] : memref<1x16xf32, #tpu.memory_space<vmem>>, vector<1x16xf32>
    %146 = vector.broadcast %145 : vector<1x16xf32> to vector<2x16xf32>
    %147 = arith.addf %144, %146 : vector<2x16xf32>
    %148 = vector.extract_strided_slice %147 {offsets = [0, 0], sizes = [2, 8], strides = [1, 1]} : vector<2x16xf32> to vector<2x8xf32>
    %c0_101 = arith.constant 0 : index
    %c0_102 = arith.constant 0 : index
    %149 = vector.load %arg33[%c0_101, %c0_102] : memref<2x8xf32, #tpu.memory_space<vmem>>, vector<2x8xf32>
    %150 = arith.subf %148, %149 : vector<2x8xf32>
    %151 = vector.extract_strided_slice %147 {offsets = [0, 8], sizes = [2, 8], strides = [1, 1]} : vector<2x16xf32> to vector<2x8xf32>
    %152 = vector.broadcast %132 : vector<1x8xf32> to vector<2x8xf32>
    %153 = arith.subf %151, %152 : vector<2x8xf32>
    %154 = arith.mulf %150, %150 : vector<2x8xf32>
    %155 = vector.shape_cast %154 : vector<2x8xf32> to vector<1x2x8xf32>
    %cst_103 = arith.constant dense<0.000000e+00> : vector<1xf32>
    %156 = vector.multi_reduction <add>, %155, %cst_103 [1, 2] : vector<1x2x8xf32> to vector<1xf32>
    %157 = vector.shape_cast %156 : vector<1xf32> to vector<1x1x1xf32>
    %158 = vector.extract %157[0, 0, 0] : f32 from vector<1x1x1xf32>
    %159 = vector.broadcast %158 : f32 to vector<1x1xf32>
    %160 = arith.mulf %153, %153 : vector<2x8xf32>
    %161 = vector.shape_cast %160 : vector<2x8xf32> to vector<1x2x8xf32>
    %cst_104 = arith.constant dense<0.000000e+00> : vector<1xf32>
    %162 = vector.multi_reduction <add>, %161, %cst_104 [1, 2] : vector<1x2x8xf32> to vector<1xf32>
    %163 = vector.shape_cast %162 : vector<1xf32> to vector<1x1x1xf32>
    %164 = vector.extract %163[0, 0, 0] : f32 from vector<1x1x1xf32>
    %165 = vector.broadcast %164 : f32 to vector<1x1xf32>
    %166 = arith.addf %159, %165 : vector<1x1xf32>
    %167 = vector.extract %166[0, 0] : f32 from vector<1x1xf32>
    %cst_105 = arith.constant 3.125000e-02 : f32
    %168 = arith.mulf %167, %cst_105 : f32
    %c0_106 = arith.constant 0 : index
    %c0_107 = arith.constant 0 : index
    %169 = memref.load %arg37[%c0_106, %c0_107] : memref<1x1xf32, #tpu.memory_space<smem>>
    memref.store %168, %arg37[%c0_106, %c0_107] : memref<1x1xf32, #tpu.memory_space<smem>>
    return
  }
}

</mosaic_0001>

<bundles_post_ra>
// kernel: mai_gem_forward.1
= control target key start
LH: loop header
LB: loop body
LE: loop exit
PB: predicated region body
PF: predicated region fallthrough
CT: control target
= control target key end

     0   :  { %s3364_s6 = smov 1   ;;  %s3365_s10 = smov 2   ;;  %s3899_s0 = inlined_call_operand.smem [shape: u32[38], index: -1, kind: input, shape index: {}] }
   0x1   :  { %s3423_s5 = sld [smem:[%s3899_s0]]   ;;  %s3366_s14 = smov 3  }
   0x2   :  { %s3428_s9 = sld [smem:[%s3899_s0 + %s3364_s6]]   ;;  %s3367_s18 = smov 4  }
   0x3   :  { %s3433_s13 = sld [smem:[%s3899_s0 + %s3365_s10]]   ;;  %s3368_s22 = smov 5  }
   0x4   :  { %s3438_s17 = sld [smem:[%s3899_s0 + %s3366_s14]]   ;;  %s3369_s26 = smov 6  }
   0x5   :  { %s3443_s21 = sld [smem:[%s3899_s0 + %s3367_s18]]   ;;  %s3370_s30 = smov 7  }
   0x6   :  { %s3448_s25 = sld [smem:[%s3899_s0 + %s3368_s22]]   ;;  %s3371_s4 = smov 8  }
   0x7   :  { %s3453_s29 = sld [smem:[%s3899_s0 + %s3369_s26]]   ;;  %s3372_s10 = smov 9  }
   0x8   :  { %3905 = sst [smem:[#allocation9_spill]] %s3428_s9  ;;  %s3373_s15 = smov 10  }
   0x9   :  { %3906 = sst [smem:[#allocation10_spill]] %s3433_s13  ;;  %s3374_s20 = smov 11  }
   0xa   :  { %3907 = sst [smem:[#allocation11_spill]] %s3438_s17  ;;  %s3375_s26 = smov 12  }
   0xb   :  { %s3458_s3 = sld [smem:[%s3899_s0 + %s3370_s30]]   ;;  %s3376_s1 = smov 13  }
   0xc   :  { %3908 = sst [smem:[#allocation12_spill]] %s3448_s25  ;;  %s3377_s7 = smov 14  }
   0xd   :  { %s3463_s8 = sld [smem:[%s3899_s0 + %s3371_s4]]   ;;  %s3379_s22 = smov 16  }
   0xe   :  { %s3468_s14 = sld [smem:[%s3899_s0 + %s3372_s10]]   ;;  %s3380_s28 = smov 17  }
   0xf   :  { %s3473_s19 = sld [smem:[%s3899_s0 + %s3373_s15]]   ;;  %s3378_s15 = smov 15  }
  0x10   :  { %s3478_s24 = sld [smem:[%s3899_s0 + %s3374_s20]]  }
  0x11   :  { %s3483_s30 = sld [smem:[%s3899_s0 + %s3375_s26]]  }
  0x12   :  { %s3488_s6 = sld [smem:[%s3899_s0 + %s3376_s1]]  }
  0x13   :  { %s3493_s12 = sld [smem:[%s3899_s0 + %s3377_s7]]   ;;  %s3381_s7 = smov 18  }
  0x14   :  { %s3498_s20 = sld [smem:[%s3899_s0 + %s3378_s15]]   ;;  %s3382_s15 = smov 19  }
  0x15   :  { %s3503_s27 = sld [smem:[%s3899_s0 + %s3379_s22]]   ;;  %s3383_s22 = smov 20  }
  0x16   :  { %s3508_s4 = sld [smem:[%s3899_s0 + %s3380_s28]]   ;;  %s3384_s28 = smov 21  }
  0x17   :  { %s3513_s9 = sld [smem:[%s3899_s0 + %s3381_s7]]   ;;  %s3385_s7 = smov 22  }
  0x18   :  { %3909 = sst [smem:[#allocation13_spill]] %s3488_s6 }
  0x19   :  { %s3518_s17 = sld [smem:[%s3899_s0 + %s3382_s15]]   ;;  %s3386_s15 = smov 23  }
  0x1a   :  { %3910 = sst [smem:[#allocation14_spill]] %s3498_s20 }
  0x1b   :  { %3911 = sst [smem:[#allocation15_spill]] %s3503_s27 }
  0x1c   :  { %3912 = sst [smem:[#allocation16_spill]] %s3508_s4 }
  0x1d   :  { %3913 = sst [smem:[#allocation17_spill]] %s3513_s9 }
  0x1e   :  { %s3523_s13 = sld [smem:[%s3899_s0 + %s3383_s22]]   ;;  %s3387_s22 = smov 24  }
  0x1f   :  { %s3528_s4 = sld [smem:[%s3899_s0 + %s3384_s28]]   ;;  %s3388_s28 = smov 25  }
  0x20   :  { %s3533_s9 = sld [smem:[%s3899_s0 + %s3385_s7]]   ;;  %s3389_s7 = smov 26  }
  0x21   :  { %s3538_s27 = sld [smem:[%s3899_s0 + %s3386_s15]]   ;;  %s3390_s15 = smov 27  }
  0x22   :  { %s3543_s20 = sld [smem:[%s3899_s0 + %s3387_s22]]   ;;  %s3391_s22 = smov 28  }
  0x23   :  { %s3548_s6 = sld [smem:[%s3899_s0 + %s3388_s28]]   ;;  %s3392_s28 = smov 29  }
  0x24   :  { %s3553_s25 = sld [smem:[%s3899_s0 + %s3389_s7]]   ;;  %s3393_s7 = smov 30  }
  0x27   :  { %3914 = sst [smem:[#allocation18_spill]] %s3538_s27 }
  0x28   :  { %3915 = sst [smem:[#allocation19_spill]] %s3543_s20 }
  0x29   :  { %3916 = sst [smem:[#allocation20_spill]] %s3548_s6 }
  0x2a   :  { %3917 = sst [smem:[#allocation21_spill]] %s3553_s25 }
  0x2b   :  { %s3558_s27 = sld [smem:[%s3899_s0 + %s3390_s15]]   ;;  %s3394_s15 = smov 31  }
  0x2c   :  { %s3563_s20 = sld [smem:[%s3899_s0 + %s3391_s22]]   ;;  %s3395_s22 = smov 32  }
  0x2d   :  { %s3568_s6 = sld [smem:[%s3899_s0 + %s3392_s28]]   ;;  %s3396_s28 = smov 33  }
  0x2e   :  { %s3573_s25 = sld [smem:[%s3899_s0 + %s3393_s7]]   ;;  %s3397_s7 = smov 34  }
  0x31   :  { %3918 = sst [smem:[#allocation22_spill]] %s3558_s27 }
  0x32   :  { %3919 = sst [smem:[#allocation23_spill]] %s3563_s20 }
  0x33   :  { %3920 = sst [smem:[#allocation24_spill]] %s3568_s6 }
  0x34   :  { %3921 = sst [smem:[#allocation25_spill]] %s3573_s25 }
  0x35   :  { %s3578_s27 = sld [smem:[%s3899_s0 + %s3394_s15]]   ;;  %s3398_s15 = smov 35  }
  0x36   :  { %s3583_s20 = sld [smem:[%s3899_s0 + %s3395_s22]]   ;;  %s3399_s22 = smov 36  }
  0x37   :  { %s3588_s6 = sld [smem:[%s3899_s0 + %s3396_s28]]   ;;  %s3400_s28 = smov 37  }
  0x38   :  { %s3593_s25 = sld [smem:[%s3899_s0 + %s3397_s7]]  }
  0x3b   :  { %3922 = sst [smem:[#allocation26_spill]] %s3578_s27 }
  0x3c   :  { %3923 = sst [smem:[#allocation27_spill]] %s3583_s20 }
  0x3d   :  { %3924 = sst [smem:[#allocation28_spill]] %s3588_s6 }
  0x3e   :  { %s3598_s27 = sld [smem:[%s3899_s0 + %s3398_s15]]  }
  0x3f   :  { %s3603_s20 = sld [smem:[%s3899_s0 + %s3399_s22]]  }
  0x40   :  { %s3608_s6 = sld [smem:[%s3899_s0 + %s3400_s28]]  }
  0x41   :  { %81 = vsyncpa [#allocation3], 0  ;;  %v151_v0 = vld [vmem:[%s3423_s5] sm:$0xff]  ;;  %v152_v1 = vld [vmem:[%s3423_s5 + $0x8] sm:$0xff]  ;;  %vm182_vm0 = vcmask 130048  }
  0x42   :  { %v264_v2 = vld [vmem:[%s3518_s17] sm:$0xff]  ;;  %v3091_v3 = vpack.c.bf16 %v152_v1, %v151_v0  ;;  %2837 = vmatprep.mubr.msk.f32.mxu0 %vm182_vm0, %v151_v0  ;;  %v265_v4 = vld [vmem:[%s3518_s17 + $0x8] sm:$0xff]  ;;  %v266_v11 = vld [vmem:[%s3518_s17 + $0x10] sm:$0xff] }
  0x43   :  { %2844 = vmatprep.mubr.msk.f32.mxu1 %vm182_vm0, %v264_v2  ;;  %v539_v5 = vld [vmem:[%s3463_s8] sm:$0xff]  ;;  %v540_v6 = vld [vmem:[%s3463_s8 + $0x8] sm:$0xff] }
  0x44   :  { %3092 = vmatprep.subr.bf16.mxu1 %v3091_v3  ;;  %v3099_v7 = vpack.c.bf16 %v540_v6, %v539_v5  ;;  %v173_v8 = vld [vmem:[%s3443_s21] sm:$0xff]  ;;  %v174_v9 = vld [vmem:[%s3443_s21 + $0x8] sm:$0xff] }
  0x45   :  { %3094 = vmatpush3.bf16.msra.mxu1 %v3091_v3  ;;  %v401_v10 = vld [vmem:[%s3453_s29] sm:$0xff]  ;;  %v3087_v12 = vpack.c.bf16 %v174_v9, %v173_v8  ;;  %v402_v13 = vld [vmem:[%s3453_s29 + $0x8] sm:$0xff] }
  0x46   :  { %82 = vsyncpa [#allocation5], 0  ;;  %3100 = vmatprep.subr.bf16.mxu1 %v3099_v7  ;;  %v3095_v14 = vpack.c.bf16 %v402_v13, %v401_v10  ;;  %v267_v15 = vld [vmem:[%s3518_s17 + $0x18] sm:$0xff]  ;;  %v268_v16 = vld [vmem:[%s3518_s17 + $0x20] sm:$0xff]  ;;  %vm791_vm1 = vcmask 261120   ;;  %vm969_vm3 = vcmask 523264  }
  0x47   :  { %3088 = vmatprep.subr.bf16.mxu0 %v3087_v12  ;;  %v269_v17 = vld [vmem:[%s3518_s17 + $0x28] sm:$0xff]  ;;  %v270_v18 = vld [vmem:[%s3518_s17 + $0x30] sm:$0xff]  ;;  %v271_v19 = vld [vmem:[%s3518_s17 + $0x38] sm:$0xff]  ;;  %s3927_s0 = sld [smem:[#allocation12_spill]]  ;;  %s3928_s5 = sld [smem:[#allocation13_spill]]  ;;  %vm3402_vm4 = vmmov 0  }
  0x48   :  { %2845 = vmatmul.mubr.msk.f32.vlgmr.msra.gmra.mrb[0].mxu1 %vm182_vm0, %v265_v4  ;;  %3090 = vmatpush3.bf16.msra.mxu0 %v3087_v12  ;;  %v653_v20 = vld [vmem:[%s3473_s19] sm:$0xff]  ;;  %v654_v21 = vld [vmem:[%s3473_s19 + $0x8] sm:$0xff]  ;;  %v770_v46 = vld [vmem:[%s3528_s4 + $0x18] sm:$0xff]  ;;  %s3931_s17 = sld [smem:[#allocation15_spill]]  ;;  %vm1541_vm5 = vcmask 64512   ;;  %s3403_s21 = smov 8  }
  0x49   :  { %2847 = vmatprep.mubr.msk.f32.mxu1 %vm182_vm0, %v266_v11  ;;  %3102 = vmatpush3.bf16.msra.mxu1 %v3099_v7  ;;  %v3103_v22 = vpack.c.bf16 %v654_v21, %v653_v20  ;;  %v2630_v31 = vld [vmem:[%s3468_s14] ss:$0 sm:$0xff]  ;;  %v768_v35 = vld [vmem:[%s3528_s4 + $0x8] sm:$0xff]  ;;  %v769_v50 = vld [vmem:[%s3528_s4 + $0x10] sm:$0xff]  ;;  %s3404_s29 = smov 16   ;;  %s3406_s8 = smov 32  }
  0x4a   :  { %3096 = vmatprep.subr.bf16.mxu0 %v3095_v14  ;;  %v3664_v32 = vld [vmem:[%s3458_s3] ss:$0 sm:$0xff]  ;;  %vm3680_vm2 = vmpackc.low %vm791_vm1, %vm791_vm1  ;;  %v772_v58 = vld [vmem:[%s3528_s4 + $0x28] sm:$0xff]  ;;  %s3405_s3 = smov 24   ;;  %s3932_s14 = sld [smem:[#allocation23_spill]]  ;;  %vm157_vm6 = vcmask 25600  }
  0x4b   :  { %2838 = vmatmul.mubr.msk.f32.vlgmr.msra.gmra.mrb[0].mxu0 %vm182_vm0, %v152_v1  ;;  %v767_v39 = vld [vmem:[%s3528_s4] sm:$0xff]  ;;  %v774_v5 = vld [vmem:[%s3528_s4 + $0x38] sm:$0xff]  ;;  %v773_v9 = vld [vmem:[%s3528_s4 + $0x30] sm:$0xff]  ;;  %s3407_s19 = smov 40   ;;  %s3936_s7 = sld [smem:[#allocation10_spill]]  ;;  %vm2115_vm7 = vcmask 195584  }
  0x4c   :  { %2848 = vmatmul.mubr.msk.f32.gmra.mrb[2].mxu1 %vm182_vm0, %v267_v15  ;;  %3098 = vmatpush3.bf16.msra.mxu0 %v3095_v14  ;;  %v771_v62 = vld [vmem:[%s3528_s4 + $0x20] sm:$0xff]  ;;  %s3935_s4 = sld [smem:[#allocation24_spill]]  ;;  %s3937_s10 = sld [smem:[#allocation11_spill]]  ;;  %vm2118_vm8 = vcmask 326656   ;;  %vm2120_vm9 = vcmask 392192   ;;  %vm2122_vm10 = vcmask 457728  }
  0x4d   :  { %2850 = vmatprep.mubr.msk.f32.mxu1 %vm182_vm0, %v268_v16  ;;  %3104 = vmatprep.subr.bf16.mxu0 %v3103_v22  ;;  %v2639_v11 = vld [vmem:[%s3478_s24] ss:$0 sm:$0xff]  ;;  %s3933_s24 = sld [smem:[#allocation16_spill]]  ;;  %s3410_s11 = smov 56   ;;  %vm2216_vm11 = vcmask 1041408   ;;  %vm2500_vm12 = vcmask 58368  }
  0x4e   :  { %s3938_s15 = sld [smem:[#allocation26_spill]]  ;;  %s3939_s16 = sld [smem:[#allocation25_spill]] }
  0x4f   :  { %s3940_s18 = sld [smem:[#allocation17_spill]]  ;;  %s3942_s26 = sld [smem:[#allocation20_spill]] }
  0x50   :  { %2851 = vmatmul.mubr.msk.f32.gmra.mrb[4].mxu1 %vm182_vm0, %v269_v17  ;;  %s3941_s22 = sld [smem:[#allocation9_spill]]  ;;  %s3943_s28 = sld [smem:[#allocation19_spill]] }
  0x51   :  { %2853 = vmatprep.mubr.msk.f32.mxu1 %vm182_vm0, %v270_v18  ;;  %s3944_s2 = sld [smem:[#allocation21_spill]] }
  0x54   :  { %2854 = vmatmul.mubr.msk.f32.gmra.mrb[6].mxu1 %vm182_vm0, %v271_v19 }
 0x11b   :  { %v2846_v23 = vpop.f32.mrb[0].mxu1 }
 0x11c   :  { %v362_v24 = vpop.f32.mrb[1].mxu1 }
 0x11d   :  { %2860 = vmatprep.mubr.msk.f32.mxu0 %vm182_vm0, %v362_v24  ;;  %2876 = vmatprep.mubr.msk.f32.mxu1 %vm182_vm0, %v362_v24 }
 0x11e   :  { %2861 = vmatmul.mubr.msk.f32.vlgmr.msra.gmra.mrb[2].mxu0 %vm182_vm0, %v2846_v23  ;;  %2877 = vmatmul.mubr.msk.f32.vlgmr.msra.gmra.mrb[8].mxu1 %vm182_vm0, %v2846_v23 }
 0x11f   :  { %v2849_v25 = vpop.f32.mrb[2].mxu1  ;;  %3106 = vmatpush3.bf16.msra.mxu0 %v3103_v22 }
 0x120   :  { %v372_v26 = vpop.f32.mrb[3].mxu1 }
 0x121   :  { %2863 = vmatprep.mubr.msk.f32.mxu0 %vm182_vm0, %v372_v26  ;;  %2879 = vmatprep.mubr.msk.f32.mxu1 %vm182_vm0, %v372_v26 }
 0x122   :  { %2864 = vmatmul.mubr.msk.f32.gmra.mrb[4].mxu0 %vm182_vm0, %v2849_v25  ;;  %2880 = vmatmul.mubr.msk.f32.gmra.mrb[10].mxu1 %vm182_vm0, %v2849_v25 }
 0x123   :  { %v2852_v27 = vpop.f32.mrb[4].mxu1 }
 0x124   :  { %v382_v28 = vpop.f32.mrb[5].mxu1 }
 0x125   :  { %2866 = vmatprep.mubr.msk.f32.mxu0 %vm182_vm0, %v382_v28  ;;  %2882 = vmatprep.mubr.msk.f32.mxu1 %vm182_vm0, %v382_v28 }
 0x126   :  { %2867 = vmatmul.mubr.msk.f32.gmra.mrb[6].mxu0 %vm182_vm0, %v2852_v27  ;;  %2883 = vmatmul.mubr.msk.f32.gmra.mrb[12].mxu1 %vm182_vm0, %v2852_v27 }
 0x127   :  { %v2855_v29 = vpop.f32.mrb[6].mxu1 }
 0x128   :  { %v392_v30 = vpop.f32.mrb[7].mxu1 }
 0x129   :  { %2869 = vmatprep.mubr.msk.f32.mxu0 %vm182_vm0, %v392_v30  ;;  %2885 = vmatprep.mubr.msk.f32.mxu1 %vm182_vm0, %v392_v30 }
 0x12a   :  { %2870 = vmatmul.mubr.msk.f32.gmra.mrb[8].mxu0 %vm182_vm0, %v2855_v29  ;;  %2886 = vmatmul.mubr.msk.f32.gmra.mrb[14].mxu1 %vm182_vm0, %v2855_v29 }
 0x12b   :  { %2892 = vmatprep.mubr.msk.f32.mxu0 %vm182_vm0, %v362_v24 }
 0x12e   :  { %2893 = vmatmul.mubr.msk.f32.vlgmr.msra.gmra.mrb[10].mxu0 %vm182_vm0, %v2846_v23 }
 0x12f   :  { %2895 = vmatprep.mubr.msk.f32.mxu0 %vm182_vm0, %v372_v26 }
 0x132   :  { %2896 = vmatmul.mubr.msk.f32.gmra.mrb[12].mxu0 %vm182_vm0, %v2849_v25 }
 0x133   :  { %2898 = vmatprep.mubr.msk.f32.mxu0 %vm182_vm0, %v382_v28 }
 0x136   :  { %2899 = vmatmul.mubr.msk.f32.gmra.mrb[14].mxu0 %vm182_vm0, %v2852_v27 }
 0x137   :  { %2901 = vmatprep.mubr.msk.f32.mxu0 %vm182_vm0, %v392_v30 }
 0x13a   :  { %2902 = vmatmul.mubr.msk.f32.gmra.mrb[16].mxu0 %vm182_vm0, %v2855_v29 }
 0x1f1   :  { %v3666_v33 = vpop.f32.mrb[2].mxu0  ;;  %v2878_v34 = vpop.f32.mrb[8].mxu1 }
 0x1f2   :  { %v620_v36 = vadd.f32 %v2878_v34, %v2630_v31  ;;  %v500_v37 = vpop.f32.mrb[3].mxu0  ;;  %v614_v38 = vpop.f32.mrb[9].mxu1 }
 0x1f3   :  { %v501_v40 = vadd.f32 %v3664_v32, %v500_v37  ;;  %v615_v41 = vadd.f32 %v2630_v31, %v614_v38 }
 0x1f4   :  { %v776_v42 = vmul.f32 %v768_v35, %v620_v36 }
 0x1f5   :  { %v775_v43 = vmul.f32 %v767_v39, %v615_v41  ;;  %2920 = vmatprep.mubr.msk.f32.mxu1 %vm791_vm1, %v501_v40  ;;  %v3672_v44 = vpop.f32.mrb[4].mxu0  ;;  %v2881_v45 = vpop.f32.mrb[10].mxu1 }
 0x1f6   :  { %v630_v47 = vadd.f32 %v2881_v45, %v2630_v31  ;;  %v3675_v48 = vpop.f32.mrb[5].mxu0  ;;  %v624_v49 = vpop.f32.mrb[11].mxu1 }
 0x1f7   :  { %v3107_v52 = vpack.c.bf16 %v776_v42, %v775_v43  ;;  %v625_v53 = vadd.f32 %v2630_v31, %v624_v49  ;;  %v511_v49 = vadd.f32 %v3664_v32, %v3675_v48 }
 0x1f8   :  { %v778_v54 = vmul.f32 %v770_v46, %v630_v47  ;;  %v506_v47 = vadd.f32 %v3666_v33, %v3664_v32 }
 0x1f9   :  { %v777_v55 = vmul.f32 %v769_v50, %v625_v53  ;;  %3109 = vmatprep.subr.msk.bf16.mxu1 %vm3680_vm2, %v3107_v52  ;;  %v3686_v56 = vpop.f32.mrb[6].mxu0  ;;  %v2884_v57 = vpop.f32.mrb[12].mxu1 }
 0x1fa   :  { %3112 = vmatpush3.bf16.xpose.msk.msra.mxu1 %vm3680_vm2, %v3107_v52  ;;  %v3691_v59 = vpop.f32.mrb[7].mxu0  ;;  %v640_v60 = vadd.f32 %v2884_v57, %v2630_v31  ;;  %v634_v61 = vpop.f32.mrb[13].mxu1  ;;  %v526_v33 = vadd.f32 %v3686_v56, %v3664_v32  ;;  %v954_v56 = vld [vmem:[%s3533_s9 + $0x8] sm:$0xff] }
 0x1fb   :  { %v3113_v63 = vpack.c.bf16 %v778_v54, %v777_v55  ;;  %v635_v0 = vadd.f32 %v2630_v31, %v634_v61  ;;  %v521_v51 = vadd.f32 %v3664_v32, %v3691_v59  ;;  %v953_v54 = vld [vmem:[%s3533_s9] sm:$0xff] }
 0x1fc   :  { %v780_v1 = vmul.f32 %v772_v58, %v640_v60 }
 0x1fd   :  { %3115 = vmatprep.subr.msk.bf16.mxu1 %vm3680_vm2, %v3113_v63  ;;  %v3696_v2 = vpop.f32.mrb[8].mxu0  ;;  %v779_v3 = vmul.f32 %v771_v62, %v635_v0  ;;  %v2887_v4 = vpop.f32.mrb[14].mxu1 }
 0x1fe   :  { %v530_v6 = vpop.f32.mrb[9].mxu0  ;;  %v650_v7 = vadd.f32 %v2887_v4, %v2630_v31  ;;  %v644_v8 = vpop.f32.mrb[15].mxu1 }
 0x1ff   :  { %v3119_v10 = vpack.c.bf16 %v780_v1, %v779_v3  ;;  %v645_v12 = vadd.f32 %v2630_v31, %v644_v8  ;;  %v531_v48 = vadd.f32 %v3664_v32, %v530_v6  ;;  %v956_v1 = vld [vmem:[%s3533_s9 + $0x18] sm:$0xff]  ;;  %v957_v6 = vld [vmem:[%s3533_s9 + $0x20] sm:$0xff] }
 0x200   :  { %v782_v13 = vmul.f32 %v774_v5, %v650_v7 }
 0x201   :  { %v2894_v14 = vpop.f32.mrb[10].mxu0  ;;  %v781_v15 = vmul.f32 %v773_v9, %v645_v12 }
 0x202   :  { %v734_v16 = vadd.f32 %v2894_v14, %v2639_v11  ;;  %v728_v17 = vpop.f32.mrb[11].mxu0  ;;  %3118 = vmatpush3.bf16.xpose.msk.msra.mxu1 %vm3680_vm2, %v3113_v63 }
 0x203   :  { %v729_v18 = vadd.f32 %v2639_v11, %v728_v17  ;;  %3121 = vmatprep.subr.msk.bf16.mxu1 %vm3680_vm2, %v3119_v10  ;;  %v3125_v19 = vpack.c.bf16 %v782_v13, %v781_v15 }
 0x204   :  { %v784_v20 = vmul.f32 %v768_v35, %v734_v16  ;;  %v959_v16 = vld [vmem:[%s3533_s9 + $0x30] sm:$0xff] }
 0x205   :  { %v783_v21 = vmul.f32 %v767_v39, %v729_v18  ;;  %v2897_v22 = vpop.f32.mrb[12].mxu0 }
 0x206   :  { %v744_v23 = vadd.f32 %v2897_v22, %v2639_v11  ;;  %v738_v24 = vpop.f32.mrb[13].mxu0 }
 0x207   :  { %v739_v25 = vadd.f32 %v2639_v11, %v738_v24  ;;  %v3131_v26 = vpack.c.bf16 %v784_v20, %v783_v21  ;;  %v960_v21 = vld [vmem:[%s3533_s9 + $0x38] sm:$0xff] }
 0x208   :  { %v786_v27 = vmul.f32 %v770_v46, %v744_v23 }
 0x209   :  { %v785_v28 = vmul.f32 %v769_v50, %v739_v25  ;;  %v2900_v29 = vpop.f32.mrb[14].mxu0  ;;  %3132 = vmatprep.subr.bf16.mxu0 %v3131_v26  ;;  %v516_v50 = vadd.f32 %v3672_v44, %v3664_v32  ;;  %v536_v44 = vadd.f32 %v3696_v2, %v3664_v32 }
 0x20a   :  { %v754_v30 = vadd.f32 %v2900_v29, %v2639_v11  ;;  %v748_v31 = vpop.f32.mrb[15].mxu0  ;;  %3124 = vmatpush3.bf16.xpose.msk.msra.mxu1 %vm3680_vm2, %v3119_v10  ;;  %3134 = vmatpush3.bf16.msra.mxu0 %v3131_v26 }
 0x20b   :  { %v749_v34 = vadd.f32 %v2639_v11, %v748_v31  ;;  %v3135_v36 = vpack.c.bf16 %v786_v27, %v785_v28  ;;  %3127 = vmatprep.subr.msk.bf16.mxu1 %vm3680_vm2, %v3125_v19 }
 0x20c   :  { %v788_v35 = vmul.f32 %v772_v58, %v754_v30 }
 0x20d   :  { %v787_v37 = vmul.f32 %v771_v62, %v749_v34  ;;  %v2903_v38 = vpop.f32.mrb[16].mxu0  ;;  %3136 = vmatprep.subr.bf16.mxu0 %v3135_v36  ;;  %v955_v62 = vld [vmem:[%s3533_s9 + $0x10] sm:$0xff] }
 0x20e   :  { %v764_v39 = vadd.f32 %v2903_v38, %v2639_v11  ;;  %v758_v40 = vpop.f32.mrb[17].mxu0  ;;  %3138 = vmatpush3.bf16.msra.mxu0 %v3135_v36 }
 0x20f   :  { %v759_v41 = vadd.f32 %v2639_v11, %v758_v40  ;;  %v3139_v42 = vpack.c.bf16 %v788_v35, %v787_v37  ;;  %v958_v11 = vld [vmem:[%s3533_s9 + $0x28] sm:$0xff]  ;;  %s3929_s9 = sld [smem:[#allocation18_spill]] }
 0x210   :  { %v790_v43 = vmul.f32 %v774_v5, %v764_v39 }
 0x211   :  { %v789_v45 = vmul.f32 %v773_v9, %v759_v41  ;;  %3140 = vmatprep.subr.bf16.mxu0 %v3139_v42 }
 0x212   :  { %3130 = vmatpush3.bf16.xpose.msk.msra.mxu1 %vm3680_vm2, %v3125_v19  ;;  %3142 = vmatpush3.bf16.msra.mxu0 %v3139_v42 }
 0x213   :  { %v3143_v46 = vpack.c.bf16 %v790_v43, %v789_v45 }
 0x215   :  { %3144 = vmatprep.subr.bf16.mxu0 %v3143_v46 }
 0x216   :  { %3146 = vmatpush3.bf16.msra.mxu0 %v3143_v46 }
 0x219   :  { %2921 = vmatmul.mubr.msk.f32.vlgmr.msra.gmra.mrb[16].mxu1 %vm791_vm1, %v506_v47 }
 0x21a   :  { %2923 = vmatprep.mubr.msk.f32.mxu1 %vm791_vm1, %v511_v49 }
 0x21d   :  { %2924 = vmatmul.mubr.msk.f32.gmra.mrb[18].mxu1 %vm791_vm1, %v516_v50 }
 0x21e   :  { %2926 = vmatprep.mubr.msk.f32.mxu1 %vm791_vm1, %v521_v51 }
 0x221   :  { %2927 = vmatmul.mubr.msk.f32.gmra.mrb[20].mxu1 %vm791_vm1, %v526_v33 }
 0x222   :  { %2929 = vmatprep.mubr.msk.f32.mxu1 %vm791_vm1, %v531_v48 }
 0x225   :  { %2930 = vmatmul.mubr.msk.f32.gmra.mrb[22].mxu1 %vm791_vm1, %v536_v44 }
 0x2ec   :  { %v2922_v52 = vpop.f32.mrb[16].mxu1 }
 0x2ed   :  { %v906_v53 = vpop.f32.mrb[17].mxu1  ;;  %v946_v55 = vmul.f32 0.35355338, %v2922_v52 }
 0x2ee   :  { %v945_v57 = vmul.f32 0.35355338, %v906_v53 }
 0x2ef   :  { %v962_v0 = vadd.f32 %v954_v56, %v946_v55 }
 0x2f0   :  { %v2925_v58 = vpop.f32.mrb[18].mxu1  ;;  %v961_v59 = vadd.f32 %v953_v54, %v945_v57 }
 0x2f1   :  { %v948_v60 = vmul.f32 0.35355338, %v2925_v58  ;;  %v916_v61 = vpop.f32.mrb[19].mxu1  ;;  %v973_v9 = vsel %vm969_vm3, %v962_v0, -inf }
 0x2f2   :  { %v947_v63 = vmul.f32 0.35355338, %v916_v61  ;;  %v970_v32 = vsel %vm969_vm3, %v961_v59, -inf }
 0x2f3   :  { %971 = vmax.xlane.f32.xlu0 %v970_v32  ;;  %v964_v5 = vadd.f32 %v956_v1, %v948_v60 }
 0x2f4   :  { %v2928_v2 = vpop.f32.mrb[20].mxu1  ;;  %v963_v3 = vadd.f32 %v955_v62, %v947_v63 }
 0x2f5   :  { %v926_v4 = vpop.f32.mrb[21].mxu1  ;;  %v950_v7 = vmul.f32 0.35355338, %v2928_v2  ;;  %v979_v15 = vsel %vm969_vm3, %v964_v5, -inf }
 0x2f6   :  { %v949_v8 = vmul.f32 0.35355338, %v926_v4  ;;  %v976_v10 = vsel %vm969_vm3, %v963_v3, -inf }
 0x2f7   :  { %974 = vmax.xlane.f32.xlu0 %v973_v9  ;;  %977 = vmax.xlane.f32.xlu1 %v976_v10  ;;  %v966_v20 = vadd.f32 %v958_v11, %v950_v7 }
 0x2f8   :  { %v2931_v12 = vpop.f32.mrb[22].mxu1  ;;  %v965_v13 = vadd.f32 %v957_v6, %v949_v8 }
 0x2f9   :  { %v936_v14 = vpop.f32.mrb[23].mxu1  ;;  %v952_v17 = vmul.f32 0.35355338, %v2931_v12  ;;  %v985_v23 = vsel %vm969_vm3, %v966_v20, -inf }
 0x2fa   :  { %v951_v18 = vmul.f32 0.35355338, %v936_v14  ;;  %v982_v19 = vsel %vm969_vm3, %v965_v13, -inf }
 0x2fb   :  { %980 = vmax.xlane.f32.xlu1 %v979_v15  ;;  %983 = vmax.xlane.f32.xlu0 %v982_v19  ;;  %v968_v25 = vadd.f32 %v960_v21, %v952_v17 }
 0x2fc   :  { %v967_v22 = vadd.f32 %v959_v16, %v951_v18 }
 0x2fd   :  { %v991_v26 = vsel %vm969_vm3, %v968_v25, -inf }
 0x2fe   :  { %v988_v24 = vsel %vm969_vm3, %v967_v22, -inf }
 0x2ff   :  { %986 = vmax.xlane.f32.xlu1 %v985_v23  ;;  %989 = vmax.xlane.f32.xlu0 %v988_v24 }
 0x303   :  { %992 = vmax.xlane.f32.xlu1 %v991_v26 }
 0x380   :  { %v972_v27 = vpop.xlane.xlu0 %971 }
 0x381   :  { %v994_v28 = vsub.f32 %v961_v59, %v972_v27  ;;  %v1187_v27 = vld [vmem:[%s3523_s13] sm:$0xff] }
 0x383   :  { %v1002_v29 = vmul.f32 1.442695, %v994_v28 }
 0x384   :  { %v975_v30 = vpop.xlane.xlu0 %974  ;;  %v978_v31 = vpop.xlane.xlu1 %977 }
 0x385   :  { %3278 = vpow2.f32 %v1002_v29  ;;  %v995_v34 = vsub.f32 %v962_v0, %v975_v30  ;;  %v996_v36 = vsub.f32 %v963_v3, %v978_v31 }
 0x387   :  { %v1004_v35 = vmul.f32 1.442695, %v995_v34  ;;  %v1006_v37 = vmul.f32 1.442695, %v996_v36 }
 0x388   :  { %v981_v38 = vpop.xlane.xlu1 %980  ;;  %v984_v39 = vpop.xlane.xlu0 %983 }
 0x389   :  { %3280 = vpow2.f32 %v1004_v35  ;;  %v997_v40 = vsub.f32 %v964_v5, %v981_v38  ;;  %v998_v41 = vsub.f32 %v965_v13, %v984_v39  ;;  %v1270_v39 = vld [vmem:[%s3483_s30] sm:$0xff] }
 0x38a   :  { %3282 = vpow2.f32 %v1006_v37 }
 0x38b   :  { %v1008_v42 = vmul.f32 1.442695, %v997_v40  ;;  %v1010_v43 = vmul.f32 1.442695, %v998_v41  ;;  %v1271_v40 = vld [vmem:[%s3483_s30 + $0x8] sm:$0xff] }
 0x38c   :  { %v987_v45 = vpop.xlane.xlu1 %986  ;;  %v990_v46 = vpop.xlane.xlu0 %989 }
 0x38d   :  { %3284 = vpow2.f32 %v1008_v42  ;;  %v999_v47 = vsub.f32 %v966_v20, %v987_v45  ;;  %v1000_v49 = vsub.f32 %v967_v22, %v990_v46  ;;  %v3163_v45 = vpack.c.bf16 %v1271_v40, %v1270_v39  ;;  %v1272_v46 = vld [vmem:[%s3483_s30 + $0x10] sm:$0xff] }
 0x38e   :  { %3286 = vpow2.f32 %v1010_v43 }
 0x38f   :  { %v3279_v50 = vpop.eup %3278  ;;  %v1012_v51 = vmul.f32 1.442695, %v999_v47  ;;  %v1014_v33 = vmul.f32 1.442695, %v1000_v49  ;;  %v1273_v47 = vld [vmem:[%s3483_s30 + $0x18] sm:$0xff]  ;;  %v1188_v49 = vld [vmem:[%s3523_s13 + $0x8] sm:$0xff] }
 0x390   :  { %v993_v48 = vpop.xlane.xlu1 %992  ;;  %v1018_v44 = vsel %vm969_vm3, %v3279_v50, 0.0  ;;  %s3930_s13 = sld [smem:[#allocation14_spill]]  ;;  %s3408_s30 = smov 48  }
 0x391   :  { %3288 = vpow2.f32 %v1012_v51  ;;  %v1001_v52 = vsub.f32 %v968_v25, %v993_v48  ;;  %1019 = vadd.xlane.f32.xlu0 %v1018_v44  ;;  %v1364_v51 = vld [vmem:[%s3493_s12] sm:$0xff]  ;;  %v1366_v48 = vld [vmem:[%s3493_s12 + $0x10] sm:$0xff] }
 0x392   :  { %3290 = vpow2.f32 %v1014_v33  ;;  %v1365_v33 = vld [vmem:[%s3493_s12 + $0x8] sm:$0xff] }
 0x393   :  { %v3281_v53 = vpop.eup %3280  ;;  %v1016_v54 = vmul.f32 1.442695, %v1001_v52  ;;  %v3171_v44 = vpack.c.bf16 %v1365_v33, %v1364_v51  ;;  %v1367_v52 = vld [vmem:[%s3493_s12 + $0x18] sm:$0xff]  ;;  %s3934_s12 = sld [smem:[#allocation22_spill]]  ;;  %v2247_v51 = vld [vmem:[%s3932_s14 + $0x8] sm:$0xff]  ;;  %v3409_v33 = vmov 0.0|0.0  }
 0x394   :  { %v3283_v55 = vpop.eup %3282  ;;  %v1021_v57 = vsel %vm969_vm3, %v3281_v53, 0.0 }
 0x395   :  { %3292 = vpow2.f32 %v1016_v54  ;;  %1022 = vadd.xlane.f32.xlu1 %v1021_v57  ;;  %v1024_v56 = vsel %vm969_vm3, %v3283_v55, 0.0  ;;  %3172 = vmatprep.subr.bf16.mxu1 %v3171_v44  ;;  %v2610_v57 = vld [vmem:[%s3927_s0] ss:$0 sm:$0xff]  ;;  %s3945_s0 = sld [smem:[#allocation27_spill]] }
 0x396   :  { %1025 = vadd.xlane.f32.xlu0 %v1024_v56  ;;  %3174 = vmatpush3.bf16.msra.mxu1 %v3171_v44  ;;  %v2124_v44 = vld [vmem:[%s3933_s24] sm:$0xff] }
 0x397   :  { %v3285_v58 = vpop.eup %3284 }
 0x398   :  { %v3287_v59 = vpop.eup %3286  ;;  %v1027_v60 = vsel %vm969_vm3, %v3285_v58, 0.0 }
 0x399   :  { %1028 = vadd.xlane.f32.xlu1 %v1027_v60  ;;  %v1030_v61 = vsel %vm969_vm3, %v3287_v59, 0.0 }
 0x39a   :  { %1031 = vadd.xlane.f32.xlu0 %v1030_v61 }
 0x39b   :  { %v3289_v62 = vpop.eup %3288 }
 0x39c   :  { %v3291_v63 = vpop.eup %3290  ;;  %v1033_v32 = vsel %vm969_vm3, %v3289_v62, 0.0 }
 0x39d   :  { %1034 = vadd.xlane.f32.xlu1 %v1033_v32  ;;  %v1036_v0 = vsel %vm969_vm3, %v3291_v63, 0.0  ;;  %v1456_v32 = vld [vmem:[%s3929_s9] sm:$0xff] }
 0x39e   :  { %1037 = vadd.xlane.f32.xlu0 %v1036_v0  ;;  %v2677_v0 = vld [vmem:[%s3930_s13] ss:$0 sm:$0xff]  ;;  %s3411_s13 = smov 120  }
 0x39f   :  { %v3293_v1 = vpop.eup %3292 }
 0x3a0   :  { %v1039_v2 = vsel %vm969_vm3, %v3293_v1, 0.0 }
 0x3a1   :  { %1040 = vadd.xlane.f32.xlu1 %v1039_v2 }
 0x41e   :  { %v1020_v3 = vpop.xlane.xlu0 %1019 }
 0x41f   :  { %3294 = vrcp.f32 %v1020_v3 }
 0x422   :  { %v1023_v4 = vpop.xlane.xlu1 %1022 }
 0x423   :  { %3296 = vrcp.f32 %v1023_v4  ;;  %v1026_v5 = vpop.xlane.xlu0 %1025 }
 0x424   :  { %3298 = vrcp.f32 %v1026_v5 }
 0x426   :  { %v1029_v6 = vpop.xlane.xlu1 %1028 }
 0x427   :  { %3300 = vrcp.f32 %v1029_v6  ;;  %v1032_v7 = vpop.xlane.xlu0 %1031  ;;  %v1457_v6 = vld [vmem:[%s3929_s9 + $0x8] sm:$0xff] }
 0x428   :  { %3302 = vrcp.f32 %v1032_v7  ;;  %v3787_v7 = vld [vmem:[%s3931_s17] sm:$0xff]  ;;  %s3330_s17 = scalar_lea.hbm %s3603_s20, 16 }
 0x429   :  { %v3295_v8 = vpop.eup %3294  ;;  %p3331_p0 = scmp.ne.s32.totalorder %s3603_s20, %s3330_s17  ;;  %p3334_p1 = scmp.lt.u32.totalorder %s3330_s17, %s3603_s20 }
 0x42a   :  { %v1035_v9 = vpop.xlane.xlu1 %1034  ;;  %v1043_v10 = vmul.f32 %v3295_v8, %v3279_v50  ;;  %v3167_v50 = vpack.c.bf16 %v1273_v47, %v1272_v46  ;;  %v3401_v8 = vmov 0.0  }
 0x42b   :  { %3304 = vrcp.f32 %v1035_v9  ;;  %v1038_v11 = vpop.xlane.xlu0 %1037  ;;  %p3336_p2 = pnand %p3334_p1, %p3331_p0 }
 0x42c   :  { %3306 = vrcp.f32 %v1038_v11  ;;  %2948 = vmatprep.mubr.msk.f32.mxu0 %vm969_vm3, %v1043_v10 }
 0x42d   :  { %v3297_v12 = vpop.eup %3296 }
 0x42e   :  { %v3299_v13 = vpop.eup %3298  ;;  %v1045_v14 = vmul.f32 %v3297_v12, %v3281_v53  ;;  %v1041_v15 = vpop.xlane.xlu1 %1040  ;;  %v3175_v53 = vpack.c.bf16 %v1367_v52, %v1366_v48  ;;  %v2125_v52 = vld [vmem:[%s3933_s24 + $0x8] sm:$0xff] }
 0x42f   :  { %3308 = vrcp.f32 %v1041_v15  ;;  %v1047_v16 = vmul.f32 %v3299_v13, %v3283_v55 }
 0x430   :  { %2949 = vmatmul.mubr.msk.f32.vlgmr.msra.gmra.mrb[18].mxu0 %vm969_vm3, %v1045_v14  ;;  %3176 = vmatprep.subr.bf16.mxu1 %v3175_v53 }
 0x431   :  { %v3301_v17 = vpop.eup %3300  ;;  %2951 = vmatprep.mubr.msk.f32.mxu0 %vm969_vm3, %v1047_v16  ;;  %3178 = vmatpush3.bf16.msra.mxu1 %v3175_v53  ;;  %v2126_v53 = vld [vmem:[%s3933_s24 + $0x10] sm:$0xff] }
 0x432   :  { %v3303_v18 = vpop.eup %3302  ;;  %v1049_v19 = vmul.f32 %v3301_v17, %v3285_v58  ;;  %v2674_v58 = vld [vmem:[%s3928_s5] ss:$0 sm:$0xff]  ;;  %3013 = vmatprep.subr.mxu1 %v3401_v8  ;;  %s3946_s5 = sld [smem:[#allocation28_spill]] }
 0x433   :  { %v1051_v20 = vmul.f32 %v3303_v18, %v3287_v59 }
 0x434   :  { %2952 = vmatmul.mubr.msk.f32.gmra.mrb[20].mxu0 %vm969_vm3, %v1049_v19 }
 0x435   :  { %v3305_v21 = vpop.eup %3304  ;;  %2954 = vmatprep.mubr.msk.f32.mxu0 %vm969_vm3, %v1051_v20 }
 0x436   :  { %v3307_v22 = vpop.eup %3306  ;;  %v1053_v23 = vmul.f32 %v3305_v21, %v3289_v62 }
 0x437   :  { %v1055_v24 = vmul.f32 %v3307_v22, %v3291_v63 }
 0x438   :  { %2955 = vmatmul.mubr.msk.f32.gmra.mrb[22].mxu0 %vm969_vm3, %v1053_v23 }
 0x439   :  { %v3309_v25 = vpop.eup %3308  ;;  %2957 = vmatprep.mubr.msk.f32.mxu0 %vm969_vm3, %v1055_v24 }
 0x43a   :  { %v1057_v26 = vmul.f32 %v3309_v25, %v3293_v1 }
 0x43c   :  { %2958 = vmatmul.mubr.msk.f32.gmra.mrb[24].mxu0 %vm969_vm3, %v1057_v26 }
 0x43d   :  { %2976 = vmatprep.mubr.msk.f32.mxu0 %vm969_vm3, %v1187_v27 }
 0x503   :  { %v2950_v28 = vpop.f32.mrb[18].mxu0 }
 0x504   :  { %v1148_v29 = vpop.f32.mrb[19].mxu0 }
 0x505   :  { %v3147_v30 = vpack.c.bf16 %v2950_v28, %v1148_v29 }
 0x507   :  { %v2953_v31 = vpop.f32.mrb[20].mxu0  ;;  %3148 = vmatprep.subr.bf16.mxu0 %v3147_v30 }
 0x508   :  { %v1158_v34 = vpop.f32.mrb[21].mxu0  ;;  %3150 = vmatpush3.bf16.msra.mxu0 %v3147_v30 }
 0x509   :  { %v3151_v36 = vpack.c.bf16 %v2953_v31, %v1158_v34 }
 0x50b   :  { %v2956_v35 = vpop.f32.mrb[22].mxu0  ;;  %3152 = vmatprep.subr.bf16.mxu0 %v3151_v36 }
 0x50c   :  { %v1168_v37 = vpop.f32.mrb[23].mxu0  ;;  %3154 = vmatpush3.bf16.msra.mxu0 %v3151_v36 }
 0x50d   :  { %v3155_v38 = vpack.c.bf16 %v2956_v35, %v1168_v37 }
 0x50f   :  { %v2959_v41 = vpop.f32.mrb[24].mxu0  ;;  %3156 = vmatprep.subr.bf16.mxu0 %v3155_v38 }
 0x510   :  { %v1178_v42 = vpop.f32.mrb[25].mxu0  ;;  %3158 = vmatpush3.bf16.msra.mxu0 %v3155_v38 }
 0x511   :  { %v3159_v43 = vpack.c.bf16 %v2959_v41, %v1178_v42 }
 0x513   :  { %3160 = vmatprep.subr.bf16.mxu0 %v3159_v43 }
 0x514   :  { %3162 = vmatpush3.bf16.msra.mxu0 %v3159_v43 }
 0x515   :  { %3164 = vmatprep.subr.bf16.mxu0 %v3163_v45 }
 0x517   :  { %2977 = vmatmul.mubr.msk.f32.vlgmr.msra.gmra.mrb[26].mxu0 %vm969_vm3, %v1188_v49 }
 0x518   :  { %3166 = vmatpush3.bf16.msra.mxu0 %v3163_v45 }
 0x519   :  { %3168 = vmatprep.subr.bf16.mxu0 %v3167_v50 }
 0x51c   :  { %3170 = vmatpush3.bf16.msra.mxu0 %v3167_v50  ;;  %v2246_v50 = vld [vmem:[%s3932_s14] sm:$0xff] }
 0x51d   :  { %v3196_v48 = vpack.c.bf16 %v2247_v51, %v2246_v50  ;;  %v2689_v51 = vld [vmem:[%s3940_s18] ss:$0 sm:$0xff] }
 0x5ea   :  { %v2978_v54 = vpop.f32.mrb[26].mxu0 }
 0x5eb   :  { %v1261_v55 = vpop.f32.mrb[27].mxu0 }
 0x5ec   :  { %2987 = vmatprep.mubr.msk.f32.mxu0 %vm791_vm1, %v1261_v55  ;;  %v2127_v55 = vld [vmem:[%s3933_s24 + $0x18] sm:$0xff] }
 0x5ed   :  { %2988 = vmatmul.mubr.msk.f32.vlgmr.msra.gmra.mrb[0].mxu0 %vm791_vm1, %v2978_v54  ;;  %v3184_v54 = vpack.c.bf16 %v2125_v52, %v2124_v44  ;;  %v2213_v44 = vld [vmem:[%s3941_s22] sm:$0x3] }
 0x5ee   :  { %3005 = vmatprep.mubr.msk.f32.mxu0 %vm182_vm0, %v1456_v32 }
 0x6c0   :  { %v2989_v56 = vpop.f32.mrb[0].mxu0 }
 0x6c1   :  { %v3207_v59 = vadd.f32 %v2989_v56, %v2610_v57  ;;  %v1353_v60 = vpop.f32.mrb[1].mxu0  ;;  %v3187_v56 = vpack.c.bf16 %v2127_v55, %v2126_v53 }
 0x6c2   :  { %v3209_v61 = vadd.f32 %v2610_v57, %v1353_v60  ;;  %v2245_v57 = vld [vmem:[%s3934_s12] sm:$0x3] }
 0x6c3   :  { %v3208_v63 = vadd.f32 %v3207_v59, %v2674_v58  ;;  %v2129_v59 = vld [vmem:[%s3933_s24 + $0x28] sm:$0xff] }
 0x6c4   :  { %v3210_v62 = vadd.f32 %v3209_v61, %v2674_v58  ;;  %v2128_v58 = vld [vmem:[%s3933_s24 + $0x20] sm:$0xff]  ;;  %v2130_v61 = vld [vmem:[%s3933_s24 + $0x30] sm:$0xff] }
 0x6c5   :  { %v3190_v60 = vpack.c.bf16 %v2129_v59, %v2128_v58 }
 0x6c6   :  { %2998 = vmatprep.mubr.msk.f32.mxu1 %vm791_vm1, %v3210_v62  ;;  %v2131_v62 = vld [vmem:[%s3933_s24 + $0x38] sm:$0xff] }
 0x6c7   :  { %2999 = vmatmul.mubr.msk.f32.vlgmr.msra.gmra.mrb[24].mxu1 %vm791_vm1, %v3208_v63  ;;  %v3193_v63 = vpack.c.bf16 %v2131_v62, %v2130_v61 }
 0x6c8   :  { %3014 = vmatpush3.msra.mxu1 %v3787_v7  ;;  %3015 = vmatprep.mubr.msk.f32.mxu1 %vm3402_vm4, %v3401_v8 }
 0x6c9   :  { %3023 = vmatprep.subr.mxu1 %v3401_v8 }
 0x79a   :  { %v3000_v1 = vpop.f32.mrb[24].mxu1 }
 0x79b   :  { %v1453_v2 = vadd.f32 %v3000_v1, %v2677_v0  ;;  %v1447_v3 = vpop.f32.mrb[25].mxu1 }
 0x79c   :  { %v1448_v4 = vadd.f32 %v2677_v0, %v1447_v3  ;;  %v2321_v3 = vld [vmem:[%s3935_s4] sm:$0xff] }
 0x79e   :  { %v3179_v5 = vpack.c.bf16 %v1453_v2, %v1448_v4  ;;  %v2322_v4 = vld [vmem:[%s3935_s4 + $0x8] sm:$0xff] }
 0x7a0   :  { %3180 = vmatprep.subr.bf16.mxu0 %v3179_v5 }
 0x7a1   :  { %3182 = vmatpush3.bf16.msra.mxu0 %v3179_v5  ;;  %v153_v5 = vld [vmem:[%s3936_s7] sm:$0x3] }
 0x7a2   :  { %3008 = vmatprep.subr.mxu0 %v3401_v8 }
 0x7a4   :  { %3006 = vmatmul.mubr.msk.f32.vlgmr.msra.gmra.mrb[28].mxu0 %vm182_vm0, %v1457_v6  ;;  %v3199_v6 = vpack.c.bf16 %v2322_v4, %v2321_v3  ;;  %v2232_v4 = vld [vmem:[%s3943_s28] sm:$0x1] }
 0x7a5   :  { %3010 = vmatprep.mubr.msk.f32.mxu0 %vm3402_vm4, %v3401_v8  ;;  %3009 = vmatpush3.msra.mxu0 %v3787_v7 }
 0x7a6   :  { %3018 = vmatprep.subr.mxu0 %v3401_v8 }
 0x877   :  { %v3799_v9 = vpop.f32.mrb[28].mxu0 }
 0x878   :  { %v1530_v10 = vpop.f32.mrb[29].mxu0 }
 0x879   :  { %3310 = vtanh.f32 %v1530_v10 }
 0x883   :  { %v3801_v11 = vpop.eup %3310 }
 0x884   :  { %3011 = vmatmul.mubr.msk.f32.vlgmr.msra.gmra.mrb[30].mxu0 %vm1541_vm5, %v3801_v11 }
 0x885   :  { %3019 = vmatpush3.msra.mxu0 %v3787_v7  ;;  %3020 = vmatprep.mubr.msk.f32.mxu0 %vm3402_vm4, %v3401_v8 }
 0x886   :  { %3028 = vmatprep.subr.mxu0 %v3401_v8 }
 0x957   :  { %v1611_v12 = vpop.f32.mrb[30].mxu0 }
 0x958   :  { %v1616_v13 = vrot.slane %v1611_v12, 6  ;;  %v3012_v14 = vpop.f32.mrb[31].mxu0 }
 0x95a   :  { %v1618_v15 = vadd.f32 %v1616_v13, %v1530_v10 }
 0x95c   :  { %3312 = vtanh.f32 %v1618_v15 }
 0x966   :  { %v3313_v16 = vpop.eup %3312 }
 0x967   :  { %v1621_v17 = vrot.slane %v3313_v16, 2 }
 0x969   :  { %2090 = vrot.lane.b32.xlu0 %v1621_v17, %s3403_s21  ;;  %3016 = vmatmul.mubr.msk.f32.vlgmr.msra.gmra.mrb[26].mxu1 %vm1541_vm5, %v1621_v17 }
 0x96a   :  { %3024 = vmatpush3.msra.mxu1 %v3787_v7  ;;  %3025 = vmatprep.mubr.msk.f32.mxu1 %vm3402_vm4, %v3401_v8 }
 0x96b   :  { %3033 = vmatprep.subr.mxu1 %v3401_v8 }
 0xa3c   :  { %v1690_v18 = vpop.f32.mrb[26].mxu1 }
 0xa3d   :  { %v1695_v19 = vrot.slane %v1690_v18, 4  ;;  %v3017_v20 = vpop.f32.mrb[27].mxu1 }
 0xa3f   :  { %v1697_v21 = vadd.f32 %v1695_v19, %v1530_v10  ;;  %v2091_v19 = vpop.permute.xlu0 %2090 }
 0xa41   :  { %3314 = vtanh.f32 %v1697_v21  ;;  %v2113_v21 = vsel %vm1541_vm5, %v3801_v11, %v2091_v19 }
 0xa4b   :  { %v3315_v22 = vpop.eup %3314 }
 0xa4c   :  { %v1700_v23 = vrot.slane %v3315_v22, 4 }
 0xa4e   :  { %2093 = vrot.lane.b32.xlu1 %v1700_v23, %s3404_s29  ;;  %3021 = vmatmul.mubr.msk.f32.vlgmr.msra.gmra.mrb[32].mxu0 %vm1541_vm5, %v1700_v23 }
 0xa4f   :  { %3029 = vmatpush3.msra.mxu0 %v3787_v7  ;;  %3030 = vmatprep.mubr.msk.f32.mxu0 %vm3402_vm4, %v3401_v8 }
 0xa50   :  { %3038 = vmatprep.subr.mxu0 %v3401_v8 }
 0xac0   :  { %v2094_v17 = vpop.permute.xlu1 %2093 }
 0xac1   :  { %v2114_v22 = vsel %vm182_vm0, %v2113_v21, %v2094_v17  ;;  %v2695_v21 = vld [vmem:[%s3945_s0] ss:$0 sm:$0xff] }
 0xb21   :  { %v1769_v24 = vpop.f32.mrb[32].mxu0 }
 0xb22   :  { %v1774_v25 = vrot.slane %v1769_v24, 2  ;;  %v3022_v26 = vpop.f32.mrb[33].mxu0 }
 0xb24   :  { %v1776_v27 = vadd.f32 %v1774_v25, %v1530_v10 }
 0xb26   :  { %3316 = vtanh.f32 %v1776_v27 }
 0xb30   :  { %v3317_v28 = vpop.eup %3316 }
 0xb31   :  { %v1779_v29 = vrot.slane %v3317_v28, 6 }
 0xb33   :  { %2096 = vrot.lane.b32.xlu1 %v1779_v29, %s3405_s3  ;;  %3026 = vmatmul.mubr.msk.f32.vlgmr.msra.gmra.mrb[28].mxu1 %vm1541_vm5, %v1779_v29 }
 0xb34   :  { %3034 = vmatpush3.msra.mxu1 %v3787_v7  ;;  %3035 = vmatprep.mubr.msk.f32.mxu1 %vm3402_vm4, %v3401_v8 }
 0xb35   :  { %3183 = vmatprep.subr.bf16.mxu1 %v3409_v33 }
 0xba5   :  { %v2097_v18 = vpop.permute.xlu1 %2096 }
 0xba6   :  { %v2116_v24 = vsel %vm2115_vm7, %v2114_v22, %v2097_v18 }
 0xc06   :  { %v1848_v30 = vpop.f32.mrb[28].mxu1 }
 0xc07   :  { %v1852_v31 = vadd.f32 %v3799_v9, %v1848_v30  ;;  %v3027_v34 = vpop.f32.mrb[29].mxu1  ;;  %v2404_v30 = vld [vmem:[%s3938_s15] sm:$0xff] }
 0xc09   :  { %3318 = vtanh.f32 %v1852_v31  ;;  %v2405_v31 = vld [vmem:[%s3938_s15 + $0x8] sm:$0xff] }
 0xc13   :  { %v3319_v36 = vpop.eup %3318 }
 0xc14   :  { %2099 = vrot.lane.b32.xlu1 %v3319_v36, %s3406_s8  ;;  %3031 = vmatmul.mubr.msk.f32.vlgmr.msra.gmra.mrb[34].mxu0 %vm1541_vm5, %v3319_v36  ;;  %v3202_v36 = vpack.c.bf16 %v2405_v31, %v2404_v30 }
 0xc15   :  { %3039 = vmatpush3.msra.mxu0 %v3787_v7  ;;  %3040 = vmatprep.mubr.msk.f32.mxu0 %vm3402_vm4, %v3401_v8  ;;  %v154_v7 = vld [vmem:[%s3937_s10] sm:$0x3] }
 0xc16   :  { %3195 = vmatprep.subr.bf16.mxu0 %v3409_v33  ;;  %v155_v10 = vsub.f32 %v153_v5, %v154_v7 }
 0xc18   :  { %v156_v12 = vmul.f32 %v155_v10, %v155_v10  ;;  %v2237_v10 = vld [vmem:[%s3944_s2] sm:$0x1] }
 0xc1a   :  { %v158_v13 = vsel %vm157_vm6, %v156_v12, 0.0 }
 0xc86   :  { %v2100_v20 = vpop.permute.xlu1 %2099 }
 0xce7   :  { %v1923_v35 = vpop.f32.mrb[34].mxu0 }
 0xce8   :  { %v1928_v37 = vrot.slane %v1923_v35, 6  ;;  %v3032_v38 = vpop.f32.mrb[35].mxu0  ;;  %v2406_v35 = vld [vmem:[%s3938_s15 + $0x10] sm:$0xff] }
 0xcea   :  { %v1930_v39 = vadd.f32 %v3799_v9, %v1928_v37  ;;  %v2407_v37 = vld [vmem:[%s3938_s15 + $0x18] sm:$0xff] }
 0xcec   :  { %3320 = vtanh.f32 %v1930_v39  ;;  %v3205_v39 = vpack.c.bf16 %v2407_v37, %v2406_v35 }
 0xcf6   :  { %v3321_v40 = vpop.eup %3320 }
 0xcf7   :  { %v1933_v41 = vrot.slane %v3321_v40, 2 }
 0xcf9   :  { %2102 = vrot.lane.b32.xlu0 %v1933_v41, %s3407_s19  ;;  %3036 = vmatmul.mubr.msk.f32.vlgmr.msra.gmra.mrb[30].mxu1 %vm1541_vm5, %v1933_v41 }
 0xcfa   :  { %3059 = vmatprep.mubr.msk.f32.mxu1 %vm3402_vm4, %v3401_v8  ;;  %3185 = vmatpush3.bf16.msra.mxu1 %v3184_v54 }
 0xcfb   :  { %3186 = vmatprep.subr.bf16.mxu1 %v3409_v33 }
 0xcfe   :  { %3188 = vmatpush3.bf16.msra.mxu1 %v3187_v56 }
 0xcff   :  { %3189 = vmatprep.subr.bf16.mxu1 %v3409_v33 }
 0xd02   :  { %3191 = vmatpush3.bf16.msra.mxu1 %v3190_v60 }
 0xd03   :  { %3192 = vmatprep.subr.bf16.mxu1 %v3409_v33 }
 0xd06   :  { %3194 = vmatpush3.bf16.msra.mxu1 %v3193_v63 }
 0xd6b   :  { %v2103_v23 = vpop.permute.xlu0 %2102 }
 0xdcc   :  { %v2002_v42 = vpop.f32.mrb[30].mxu1 }
 0xdcd   :  { %v2007_v43 = vrot.slane %v2002_v42, 4  ;;  %v3037_v45 = vpop.f32.mrb[31].mxu1 }
 0xdce   :  { %v2693_v45 = vld [vmem:[%s3939_s16] ss:$0 sm:$0xff] }
 0xdcf   :  { %v2009_v46 = vadd.f32 %v3799_v9, %v2007_v43 }
 0xdd1   :  { %3322 = vtanh.f32 %v2009_v46 }
 0xddb   :  { %v3323_v47 = vpop.eup %3322 }
 0xddc   :  { %v2012_v49 = vrot.slane %v3323_v47, 4 }
 0xdde   :  { %2105 = vrot.lane.b32.xlu1 %v2012_v49, %s3408_s30  ;;  %3041 = vmatmul.mubr.msk.f32.vlgmr.msra.gmra.mrb[36].mxu0 %vm1541_vm5, %v2012_v49 }
 0xddf   :  { %3066 = vmatprep.mubr.msk.f32.mxu0 %vm3402_vm4, %v3401_v8  ;;  %3197 = vmatpush3.bf16.msra.mxu0 %v3196_v48 }
 0xde0   :  { %3198 = vmatprep.subr.bf16.mxu0 %v3409_v33 }
 0xde2   :  { %3067 = vmatmul.mubr.msk.f32.vlgmr.msra.gmra.mrb[38].mxu0 %vm182_vm0, %v2245_v57 }
 0xde3   :  { %3073 = vmatprep.mubr.msk.f32.mxu0 %vm3402_vm4, %v3401_v8  ;;  %3200 = vmatpush3.bf16.msra.mxu0 %v3199_v6 }
 0xde4   :  { %3201 = vmatprep.subr.bf16.mxu0 %v3409_v33 }
 0xe02   :  { %159 = vadd.xlane.f32.xlu1 %v158_v13 }
 0xe50   :  { %v2106_v25 = vpop.permute.xlu1 %2105 }
 0xe8f   :  { %v160_v11 = vpop.xlane.xlu1 %159 }
 0xe90   :  { %v161_v34 = vrot.slane %v160_v11, 4 }
 0xe92   :  { %v162_v38 = vadd.f32 %v161_v34, %v160_v11 }
 0xe94   :  { %v163_v40 = vrot.slane %v162_v38, 2 }
 0xe96   :  { %v164_v41 = vadd.f32 %v163_v40, %v162_v38 }
 0xe98   :  { %v165_v42 = vrot.slane %v164_v41, 1 }
 0xe9a   :  { %v166_v43 = vadd.f32 %v165_v42, %v164_v41 }
 0xe9c   :  { %3213 = vpush %v166_v43 }
 0xeb1   :  { %v2081_v32 = vpop.f32.mrb[36].mxu0 }
 0xeb2   :  { %v2086_v0 = vrot.slane %v2081_v32, 2  ;;  %v3042_v1 = vpop.f32.mrb[37].mxu0 }
 0xeb4   :  { %v2088_v2 = vadd.f32 %v3799_v9, %v2086_v0 }
 0xeb5   :  { %v2317_v16 = vpop.f32.mrb[38].mxu0 }
 0xeb6   :  { %3324 = vtanh.f32 %v2088_v2  ;;  %v3068_v9 = vpop.f32.mrb[39].mxu0  ;;  %3074 = vmatmul.mubr.msk.f32.vlgmr.msra.gmra.mrb[40].mxu0 %vm182_vm0, %v2317_v16  ;;  %v2234_v2 = vld [vmem:[%s3942_s26] sm:$0x1] }
 0xeb7   :  { %3084 = vmatprep.mubr.msk.f32.mxu0 %vm3402_vm4, %v3401_v8  ;;  %v2117_v8 = vsel %vm791_vm1, %v2116_v24, %v2100_v20  ;;  %3203 = vmatpush3.bf16.msra.mxu0 %v3202_v36  ;;  %v2491_v9 = vlaneseq }
 0xeb8   :  { %v2119_v26 = vsel %vm2118_vm8, %v2117_v8, %v2103_v23  ;;  %3204 = vmatprep.subr.bf16.mxu0 %v3409_v33  ;;  %v2488_v8 = vld [vmem:[%s3946_s5] sm:$0x3] }
 0xeb9   :  { %v2121_v27 = vsel %vm2120_vm9, %v2119_v26, %v2106_v25  ;;  %v2492_v17 = vshrl.u32 %v2491_v9, 7 }
 0xebb   :  { %3206 = vmatpush3.bf16.msra.mxu0 %v3205_v39  ;;  %v2493_v18 = vsub.s32 0, %v2492_v17 }
 0xec0   :  { %v3325_v14 = vpop.eup %3324 }
 0xec1   :  { %v2109_v15 = vrot.slane %v3325_v14, 6 }
 0xec3   :  { %2110 = vrot.lane.b32.xlu0 %v2109_v15, %s3410_s11 }
 0xecd   :  { %s3214_s23 = spop %3213 }
 0xece   :  { %v168_v57 = vstv %s3214_s23 }
 0xecf   :  { %v169_v56 = vmul.f32 0.125, %v168_v57 }
 0xed1   :  { %3215 = vpush %v169_v56  ;;  %v2235_v6 = vmul.f32 %v2234_v2, %v169_v56 }
 0xf02   :  { %s3216_s1 = spop %3215 }
 0xf03   :  { %172 = sst [smem:[#allocation4]] %s3216_s1 }
 0xf35   :  { %v2111_v28 = vpop.permute.xlu0 %2110 }
 0xf36   :  { %v2123_v29 = vsel %vm2122_vm10, %v2121_v27, %v2111_v28 }
 0xf37   :  { %3060 = vmatmul.mubr.msk.f32.vlgmr.msra.gmra.mrb[32].mxu1 %vm969_vm3, %v2123_v29 }
 0xf89   :  { %v2399_v46 = vpop.f32.mrb[40].mxu0 }
 0xf8a   :  { %v2400_v47 = vadd.f32 %v2693_v45, %v2399_v46  ;;  %v3075_v49 = vpop.f32.mrb[41].mxu0 }
 0xf8c   :  { %v2403_v50 = vmax.f32 %v2400_v47, 0.0 }
 0xf8e   :  { %3085 = vmatmul.mubr.msk.f32.vlgmr.msra.gmra.mrb[42].mxu0 %vm791_vm1, %v2403_v50 }
0x100a   :  { %v2208_v48 = vpop.f32.mrb[32].mxu1 }
0x100b   :  { %v2209_v52 = vadd.f32 %v2689_v51, %v2208_v48  ;;  %v3061_v53 = vpop.f32.mrb[33].mxu1 }
0x100d   :  { %2212 = vst [vmem:[%s3593_s25] sm:$0x3] %v2209_v52  ;;  %v2214_v33 = vsub.f32 %v2209_v52, %v2213_v44 }
0x100f   :  { %v2215_v54 = vmul.f32 %v2214_v33, %v2214_v33 }
0x1011   :  { %v2217_v55 = vsel %vm2216_vm11, %v2215_v54, 0.0 }
0x1012   :  { %2218 = vadd.xlane.f32.xlu0 %v2217_v55 }
0x1061   :  { %v2484_v0 = vpop.f32.mrb[42].mxu0 }
0x1062   :  { %v3086_v1 = vpop.f32.mrb[43].mxu0  ;;  %v2485_v22 = vadd.f32 %v2695_v21, %v2484_v0 }
0x1064   :  { %v2489_v26 = vsub.f32 %v2485_v22, %v2488_v8 }
0x1066   :  { %v2499_v27 = vmul.f32 %v2489_v26, %v2489_v26 }
0x1068   :  { %v2501_v28 = vsel %vm2500_vm12, %v2499_v27, 0.0 }
0x109f   :  { %v2219_v58 = vpop.xlane.xlu0 %2218 }
0x10a0   :  { %v2220_v59 = vrot.slane %v2219_v58, 4 }
0x10a2   :  { %v2221_v60 = vadd.f32 %v2220_v59, %v2219_v58 }
0x10a4   :  { %v2222_v61 = vrot.slane %v2221_v60, 2 }
0x10a6   :  { %v2223_v62 = vadd.f32 %v2222_v61, %v2221_v60 }
0x10a8   :  { %v2224_v63 = vrot.slane %v2223_v62, 1 }
0x10aa   :  { %v2225_v32 = vadd.f32 %v2224_v63, %v2223_v62 }
0x10ac   :  { %3217 = vpush %v2225_v32 }
0x10dd   :  { %s3218_s25 = spop %3217 }
0x10de   :  { %v2227_v3 = vstv %s3218_s25 }
0x10df   :  { %v2228_v5 = vmul.f32 0.00390625, %v2227_v3 }
0x10e1   :  { %v2233_v7 = vmul.f32 %v2232_v4, %v2228_v5  ;;  %3219 = vpush %v2228_v5 }
0x10e3   :  { %v2236_v12 = vadd.f32 %v2235_v6, %v2233_v7 }
0x10e5   :  { %v2238_v13 = vadd.f32 %v2237_v10, %v2236_v12 }
0x10e7   :  { %v2691_v14 = vmul.f32 -1.442695, %v2238_v13 }
0x10e9   :  { %3326 = vpow2.f32 %v2691_v14 }
0x10f3   :  { %v3327_v15 = vpop.eup %3326 }
0x10f4   :  { %v2242_v16 = vadd.f32 1.0, %v3327_v15 }
0x10f6   :  { %3328 = vrcp.f32 %v2242_v16 }
0x1100   :  { %v3329_v19 = vpop.eup %3328 }
0x1101   :  { %v2494_v20 = vrot.slane %v3329_v19, %v2493_v18 }
0x1103   :  { %2495 = vrot.lane.b32.xlu0 %v2494_v20, %s3403_s21 }
0x1112   :  { %s3220_s9 = spop %3219 }
0x1113   :  { %2231 = sst [smem:[#allocation2]] %s3220_s9 }
0x1175   :  { %v2496_v23 = vpop.permute.xlu0 %2495 }
0x1176   :  { %v2498_v24 = vsub.f32 %v2485_v22, %v2496_v23 }
0x1178   :  { %v2512_v25 = vmul.f32 %v2498_v24, %v2498_v24 }
0x117a   :  { %2514 = vrot.lane.b32.xlu1 %v2512_v25, %s3411_s13 }
0x119e   :  { %2502 = vadd.xlane.f32.xlu1 %v2501_v28 }
0x11ec   :  { %v2515_v29 = vpop.permute.xlu1 %2514 }
0x11ed   :  { %v2517_v11 = vsel %vm2500_vm12, %v2515_v29, 0.0 }
0x11ee   :  { %2518 = vadd.xlane.f32.xlu0 %v2517_v11 }
0x122b   :  { %v2503_v30 = vpop.xlane.xlu1 %2502 }
0x122c   :  { %v2504_v31 = vrot.slane %v2503_v30, 4 }
0x122e   :  { %v2505_v34 = vadd.f32 %v2504_v31, %v2503_v30 }
0x1230   :  { %v2506_v36 = vrot.slane %v2505_v34, 2 }
0x1232   :  { %v2507_v35 = vadd.f32 %v2506_v36, %v2505_v34 }
0x1234   :  { %v2508_v37 = vrot.slane %v2507_v35, 1 }
0x1236   :  { %v2509_v38 = vadd.f32 %v2508_v37, %v2507_v35 }
0x1238   :  { %3221 = vpush %v2509_v38 }
0x1239   :  { %3339 = shalt.err (!%p3336_p2)
}
0x123a   :  { %s3412_s21 = smov [#allocation4]   ;;  %s3340_s29 = scalar_lea.hbm %s3598_s27, 16 }
0x123b   :  { %2550 = dma.smem_to_hbm %s3412_s21, 16, %s3603_s20, [#allocation5]  }
0x123c   :  { %p3341_p3 = scmp.ne.s32.totalorder %s3598_s27, %s3340_s29  ;;  %p3344_p4 = scmp.lt.u32.totalorder %s3340_s29, %s3598_s27 }
0x123e   :  { %p3346_p5 = pnand %p3344_p4, %p3341_p3 }
0x1240   :  { %3349 = shalt.err (!%p3346_p5)
}
0x1241   :  { %s3413_s3 = smov [#allocation2]  }
0x1242   :  { %2542 = dma.smem_to_hbm %s3413_s3, 16, %s3598_s27, [#allocation3]  }
0x1243   :  { %s3350_s27 = scalar_lea.hbm %s3608_s6, 16 }
0x1244   :  { %p3351_p6 = scmp.ne.s32.totalorder %s3608_s6, %s3350_s27  ;;  %p3354_p7 = scmp.lt.u32.totalorder %s3350_s27, %s3608_s6 }
0x1246   :  { %p3356_p8 = pnand %p3354_p7, %p3351_p6 }
0x1269   :  { %s3222_s20 = spop %3221 }
0x126a   :  { %v2511_v47 = vstv %s3222_s20 }
0x127b   :  { %v2519_v39 = vpop.xlane.xlu0 %2518 }
0x127c   :  { %v2520_v40 = vrot.slane %v2519_v39, 4 }
0x127e   :  { %v2521_v41 = vadd.f32 %v2520_v40, %v2519_v39 }
0x1280   :  { %v2522_v42 = vrot.slane %v2521_v41, 2 }
0x1282   :  { %v2523_v43 = vadd.f32 %v2522_v42, %v2521_v41 }
0x1284   :  { %v2524_v45 = vrot.slane %v2523_v43, 1 }
0x1286   :  { %v2525_v46 = vadd.f32 %v2524_v45, %v2523_v43 }
0x1288   :  { %3223 = vpush %v2525_v46 }
0x12b9   :  { %s3224_s8 = spop %3223 }
0x12ba   :  { %v2527_v49 = vstv %s3224_s8 }
0x12bb   :  { %v2528_v50 = vadd.f32 %v2527_v49, %v2511_v47 }
0x12bd   :  { %3225 = vpush %v2528_v50 }
0x12ee   :  { %s3226_s14 = spop %3225 }
0x12ef   :  { %s2530_s19 = smul.f32 0.03125, %s3226_s14 }
0x12f1   :  { %2532 = sst [smem:[#allocation6]] %s2530_s19 }
0x12f2   :  { %3359 = shalt.err (!%p3356_p8)
}
0x12f3   :  { %s3414_s24 = smov [#allocation6]  }
0x12f4   :  { %2558 = dma.smem_to_hbm %s3414_s24, 16, %s3608_s6, [#allocation5]  }
0x12f5   :  { %3360 = dma.done.wait [#allocation3], 16  }
0x12f6   :  { %3361 = vsyncadd [#allocation3], 4294967280 }
0x12f7   :  { %3362 = dma.done.wait [#allocation5], 32  }
0x12f8   :  { %3363 = vsyncadd [#allocation5], 4294967264 }
0x12f9   :  { %2570 = sfence }
0x12fa   :  { %2571 = vsyncpa [#allocation3], 1 }
0x12fb   :  { %2572 = vsyncpa [#allocation5], 1 }

</bundles_post_ra>
